<compile_context>
chip_gen: v5e
topology: v5e:2x2
jax: 0.10.0
libtpu: 0.0.40
codegen_flags: <defaults>
</compile_context>

<pallas_src>
import functools

import jax
import jax.numpy as jnp
import numpy as np
from jax import lax
from jax.experimental import pallas as pl
from jax.experimental.pallas import tpu as pltpu


def _topk_group_kernel(s_ref, sc_ref, o_ref, *, k, skip_self, ti, num_chunks):
    """One grid step = TB score rows.

    s_ref  : (TB, N)     row-layout scores (lane-dense).
    sc_ref : (TB, N, 1)  column-layout view of the same rows (no padding).
    o_ref  : (TB, N)     masked scores.
    """
    tb, n = s_ref.shape
    s_blk = s_ref[...]                                      # (TB, N)

    # Hoisted iotas / constants (JAX does not CSE broadcast_in_dim in loops).
    col_j = lax.broadcasted_iota(jnp.int32, (1, n), 1)      # lane index j
    base_i = lax.broadcasted_iota(jnp.int32, (ti, 1), 0)    # sublane index in chunk
    ones_row = jnp.ones((1, ti), dtype=jnp.bfloat16)        # MXU reduction operand

    ranks = []
    for b in range(tb):                                     # static per-row loop
        s = s_ref[pl.ds(b, 1), :]                           # (1, N) this row

        def cmp(sc, gi):
            # Fused "strictly greater OR (equal AND earlier index)" tile.
            return jnp.logical_or(
                sc > s, jnp.logical_and(sc == s, gi < col_j))   # (TI, N) bool

        if num_chunks == 1:
            # Whole row in one MXU pass: (1, N) @ (N, N) -> (1, N) f32 counts.
            comb = cmp(sc_ref[b], base_i)                   # sc_ref[b]: (N, 1)
            rank = jnp.dot(ones_row, comb.astype(jnp.bfloat16),
                           preferred_element_type=jnp.float32)
        else:
            def body(c, r):
                start = c * ti                              # nominal chunk start
                i0 = jnp.minimum(start, n - ti)             # clamp tail -> no OOB
                gi = base_i + i0                            # global i per sublane
                comb = jnp.logical_and(
                    cmp(sc_ref[b, pl.ds(i0, ti), :], gi),
                    gi >= start)                            # count each i exactly once
                return r + jnp.dot(ones_row, comb.astype(jnp.bfloat16),
                                   preferred_element_type=jnp.float32)

            rank = lax.fori_loop(0, num_chunks, body,
                                 jnp.zeros((1, n), jnp.float32),
                                 unroll=min(num_chunks, 8))
        ranks.append(rank)

    rank_blk = jnp.concatenate(ranks, axis=0)               # (TB, N) exact f32 counts
    keep = rank_blk < k                                     # top-k positions
    if skip_self:                                           # static flag
        keep = jnp.logical_and(keep, rank_blk > 0.5)        # rank == 0 <=> argmax
    o_ref[...] = jnp.where(keep, s_blk, jnp.zeros_like(s_blk))


def topk_group(score_vector, top_k=25, skip_self=False, block_rows=8,
               max_chunk=256):
    """Pallas equivalent of TopKGroup.forward, applied independently per row.

    score_vector: (B, N) float array (the PyTorch module uses B == 1).
    """
    assert score_vector.ndim == 2
    b, n = score_vector.shape
    assert n < (1 << 24), "f32-accumulated rank counts are exact only below 2**24"
    dtype = score_vector.dtype
    k = min(top_k, n)

    tb = block_rows
    nb = pl.cdiv(b, tb)
    b_pad = nb * tb
    x = score_vector
    if b_pad != b:
        # Pad batch to a multiple of TB with zero rows (independent per-row math;
        # padded rows are computed then dropped).
        x = jnp.concatenate([x, jnp.zeros((b_pad - b, n), dtype)], axis=0)

    ti = min(max_chunk, n)                 # MXU contraction depth per chunk
    num_chunks = pl.cdiv(n, ti)

    col = x[..., None]                     # (B_pad, N, 1) column-layout view (reshape only)

    kernel = functools.partial(_topk_group_kernel, k=k, skip_self=skip_self,
                               ti=ti, num_chunks=num_chunks)

    out = pl.pallas_call(
        kernel,
        out_shape=jax.ShapeDtypeStruct((b_pad, n), dtype),
        grid=(nb,),
        in_specs=[
            pl.BlockSpec((tb, n), lambda i: (i, 0)),          # row-layout block
            pl.BlockSpec((tb, n, 1), lambda i: (i, 0, 0)),    # column-layout block
        ],
        out_specs=pl.BlockSpec((tb, n), lambda i: (i, 0)),
        compiler_params=pltpu.CompilerParams(
            dimension_semantics=("parallel",)),   # shards across v7x TCs when nb >= 2
    )(x, col)
    return out[:b]


def _reference(score_vector, top_k=25, skip_self=False):
    """Pure-JAX reference mirroring the PyTorch code (topk + scatter mask)."""
    n = score_vector.shape[-1]
    k = min(top_k, n)

    def one_row(row):
        _, idx = lax.top_k(row, k)
        mask = jnp.zeros((n,), row.dtype).at[idx].set(1)
        if skip_self:
            mask = mask.at[jnp.argmax(row)].set(0)
        return row * mask

    return jax.vmap(one_row)(score_vector)


if __name__ == "__main__":
    key = jax.random.PRNGKey(0)
    N = 128

    # Module's real call shape: (1, N), default skip_self=False.
    sv = jax.random.normal(key, (1, N), dtype=jnp.float32)
    out = jax.block_until_ready(topk_group(sv, top_k=25, skip_self=False))
    np.testing.assert_allclose(np.asarray(out),
                               np.asarray(_reference(sv, 25, False)),
                               rtol=0, atol=0)

    # skip_self=True path.
    out2 = jax.block_until_ready(topk_group(sv, top_k=25, skip_self=True))
    np.testing.assert_allclose(np.asarray(out2),
                               np.asarray(_reference(sv, 25, True)),
                               rtol=0, atol=0)

    # Batched rows: 2 grid steps (exercises the "parallel" batch axis).
    rows = jax.random.normal(jax.random.PRNGKey(1), (16, N), dtype=jnp.float32)
    out_b = jax.block_until_ready(topk_group(rows, top_k=25, skip_self=False))
    np.testing.assert_allclose(np.asarray(out_b),
                               np.asarray(_reference(rows, 25, False)),
                               rtol=0, atol=0)

    # Chunked path: N > 256 with a non-divisible (clamped) tail chunk and a
    # padded batch (3 -> 8 rows).
    wide = jax.random.normal(jax.random.PRNGKey(2), (3, 320), dtype=jnp.float32)
    out_w = jax.block_until_ready(topk_group(wide, top_k=25, skip_self=True))
    np.testing.assert_allclose(np.asarray(out_w),
                               np.asarray(_reference(wide, 25, True)),
                               rtol=0, atol=0)

    print("KERNEL_OK")
</pallas_src>

<mosaic_0001>
module attributes {stable_mosaic.version = 11 : i64} {
  func.func @_topk_group_kernel(%arg0: i32, %arg1: memref<8x128xf32, #tpu.memory_space<vmem>>, %arg2: memref<8x128x1xf32, #tpu.memory_space<vmem>>, %arg3: memref<8x128xf32, #tpu.memory_space<vmem>>) attributes {dimension_semantics = [#tpu.dimension_semantics<parallel>], iteration_bounds = array<i64: 1>, scalar_prefetch = 0 : i64, scratch_operands = 0 : i64, tpu.core_type = #tpu.core_type<tc>, window_params = [{transform_indices = @transform_0, window_bounds = array<i64: 8, 128>}, {transform_indices = @transform_1, window_bounds = array<i64: 8, 128, 1>}, {transform_indices = @transform_2, window_bounds = array<i64: 8, 128>}]} {
    %c0 = arith.constant 0 : index
    %c0_0 = arith.constant 0 : index
    %0 = vector.load %arg1[%c0, %c0_0] : memref<8x128xf32, #tpu.memory_space<vmem>>, vector<8x128xf32>
    %1 = tpu.iota {dimensions = array<i32: 1>} : vector<1x128xi32>
    %2 = tpu.iota {dimensions = array<i32: 0>} : vector<128x1xi32>
    %cst = arith.constant 1.000000e+00 : bf16
    %3 = vector.broadcast %cst : bf16 to vector<1x128xbf16>
    %c0_1 = arith.constant 0 : index
    %c0_2 = arith.constant 0 : index
    %4 = vector.load %arg1[%c0_1, %c0_2] : memref<8x128xf32, #tpu.memory_space<vmem>>, vector<1x128xf32>
    %c0_3 = arith.constant 0 : index
    %c0_4 = arith.constant 0 : index
    %c0_5 = arith.constant 0 : index
    %5 = vector.load %arg2[%c0_3, %c0_4, %c0_5] : memref<8x128x1xf32, #tpu.memory_space<vmem>>, vector<1x128x1xf32>
    %6 = vector.shape_cast %5 : vector<1x128x1xf32> to vector<128x1xf32>
    %7 = vector.broadcast %6 : vector<128x1xf32> to vector<128x128xf32>
    %8 = vector.broadcast %4 : vector<1x128xf32> to vector<128x128xf32>
    %9 = arith.cmpf ogt, %7, %8 : vector<128x128xf32>
    %10 = vector.broadcast %6 : vector<128x1xf32> to vector<128x128xf32>
    %11 = vector.broadcast %4 : vector<1x128xf32> to vector<128x128xf32>
    %12 = arith.cmpf oeq, %10, %11 : vector<128x128xf32>
    %13 = vector.broadcast %2 : vector<128x1xi32> to vector<128x128xi32>
    %14 = vector.broadcast %1 : vector<1x128xi32> to vector<128x128xi32>
    %15 = arith.cmpi slt, %13, %14 : vector<128x128xi32>
    %16 = arith.andi %12, %15 : vector<128x128xi1>
    %17 = arith.ori %9, %16 : vector<128x128xi1>
    %18 = arith.extui %17 : vector<128x128xi1> to vector<128x128xi32>
    %19 = arith.sitofp %18 : vector<128x128xi32> to vector<128x128xf32>
    %20 = arith.truncf %19 : vector<128x128xf32> to vector<128x128xbf16>
    %cst_6 = arith.constant dense<0.000000e+00> : vector<1x128xf32>
    %21 = tpu.matmul %3, %20, %cst_6 {dimension_numbers = #tpu.dot_dimension_numbers<[1], [0], [0], [1], [0, 0, 1, 1], [], []>} : vector<1x128xbf16>, vector<128x128xbf16>, vector<1x128xf32> -> vector<1x128xf32>
    %c1 = arith.constant 1 : index
    %c0_7 = arith.constant 0 : index
    %22 = vector.load %arg1[%c1, %c0_7] : memref<8x128xf32, #tpu.memory_space<vmem>>, vector<1x128xf32>
    %c1_8 = arith.constant 1 : index
    %c0_9 = arith.constant 0 : index
    %c0_10 = arith.constant 0 : index
    %23 = vector.load %arg2[%c1_8, %c0_9, %c0_10] : memref<8x128x1xf32, #tpu.memory_space<vmem>>, vector<1x128x1xf32>
    %24 = vector.shape_cast %23 : vector<1x128x1xf32> to vector<128x1xf32>
    %25 = vector.broadcast %24 : vector<128x1xf32> to vector<128x128xf32>
    %26 = vector.broadcast %22 : vector<1x128xf32> to vector<128x128xf32>
    %27 = arith.cmpf ogt, %25, %26 : vector<128x128xf32>
    %28 = vector.broadcast %24 : vector<128x1xf32> to vector<128x128xf32>
    %29 = vector.broadcast %22 : vector<1x128xf32> to vector<128x128xf32>
    %30 = arith.cmpf oeq, %28, %29 : vector<128x128xf32>
    %31 = vector.broadcast %2 : vector<128x1xi32> to vector<128x128xi32>
    %32 = vector.broadcast %1 : vector<1x128xi32> to vector<128x128xi32>
    %33 = arith.cmpi slt, %31, %32 : vector<128x128xi32>
    %34 = arith.andi %30, %33 : vector<128x128xi1>
    %35 = arith.ori %27, %34 : vector<128x128xi1>
    %36 = arith.extui %35 : vector<128x128xi1> to vector<128x128xi32>
    %37 = arith.sitofp %36 : vector<128x128xi32> to vector<128x128xf32>
    %38 = arith.truncf %37 : vector<128x128xf32> to vector<128x128xbf16>
    %cst_11 = arith.constant dense<0.000000e+00> : vector<1x128xf32>
    %39 = tpu.matmul %3, %38, %cst_11 {dimension_numbers = #tpu.dot_dimension_numbers<[1], [0], [0], [1], [0, 0, 1, 1], [], []>} : vector<1x128xbf16>, vector<128x128xbf16>, vector<1x128xf32> -> vector<1x128xf32>
    %c2 = arith.constant 2 : index
    %c0_12 = arith.constant 0 : index
    %40 = vector.load %arg1[%c2, %c0_12] : memref<8x128xf32, #tpu.memory_space<vmem>>, vector<1x128xf32>
    %c2_13 = arith.constant 2 : index
    %c0_14 = arith.constant 0 : index
    %c0_15 = arith.constant 0 : index
    %41 = vector.load %arg2[%c2_13, %c0_14, %c0_15] : memref<8x128x1xf32, #tpu.memory_space<vmem>>, vector<1x128x1xf32>
    %42 = vector.shape_cast %41 : vector<1x128x1xf32> to vector<128x1xf32>
    %43 = vector.broadcast %42 : vector<128x1xf32> to vector<128x128xf32>
    %44 = vector.broadcast %40 : vector<1x128xf32> to vector<128x128xf32>
    %45 = arith.cmpf ogt, %43, %44 : vector<128x128xf32>
    %46 = vector.broadcast %42 : vector<128x1xf32> to vector<128x128xf32>
    %47 = vector.broadcast %40 : vector<1x128xf32> to vector<128x128xf32>
    %48 = arith.cmpf oeq, %46, %47 : vector<128x128xf32>
    %49 = vector.broadcast %2 : vector<128x1xi32> to vector<128x128xi32>
    %50 = vector.broadcast %1 : vector<1x128xi32> to vector<128x128xi32>
    %51 = arith.cmpi slt, %49, %50 : vector<128x128xi32>
    %52 = arith.andi %48, %51 : vector<128x128xi1>
    %53 = arith.ori %45, %52 : vector<128x128xi1>
    %54 = arith.extui %53 : vector<128x128xi1> to vector<128x128xi32>
    %55 = arith.sitofp %54 : vector<128x128xi32> to vector<128x128xf32>
    %56 = arith.truncf %55 : vector<128x128xf32> to vector<128x128xbf16>
    %cst_16 = arith.constant dense<0.000000e+00> : vector<1x128xf32>
    %57 = tpu.matmul %3, %56, %cst_16 {dimension_numbers = #tpu.dot_dimension_numbers<[1], [0], [0], [1], [0, 0, 1, 1], [], []>} : vector<1x128xbf16>, vector<128x128xbf16>, vector<1x128xf32> -> vector<1x128xf32>
    %c3 = arith.constant 3 : index
    %c0_17 = arith.constant 0 : index
    %58 = vector.load %arg1[%c3, %c0_17] : memref<8x128xf32, #tpu.memory_space<vmem>>, vector<1x128xf32>
    %c3_18 = arith.constant 3 : index
    %c0_19 = arith.constant 0 : index
    %c0_20 = arith.constant 0 : index
    %59 = vector.load %arg2[%c3_18, %c0_19, %c0_20] : memref<8x128x1xf32, #tpu.memory_space<vmem>>, vector<1x128x1xf32>
    %60 = vector.shape_cast %59 : vector<1x128x1xf32> to vector<128x1xf32>
    %61 = vector.broadcast %60 : vector<128x1xf32> to vector<128x128xf32>
    %62 = vector.broadcast %58 : vector<1x128xf32> to vector<128x128xf32>
    %63 = arith.cmpf ogt, %61, %62 : vector<128x128xf32>
    %64 = vector.broadcast %60 : vector<128x1xf32> to vector<128x128xf32>
    %65 = vector.broadcast %58 : vector<1x128xf32> to vector<128x128xf32>
    %66 = arith.cmpf oeq, %64, %65 : vector<128x128xf32>
    %67 = vector.broadcast %2 : vector<128x1xi32> to vector<128x128xi32>
    %68 = vector.broadcast %1 : vector<1x128xi32> to vector<128x128xi32>
    %69 = arith.cmpi slt, %67, %68 : vector<128x128xi32>
    %70 = arith.andi %66, %69 : vector<128x128xi1>
    %71 = arith.ori %63, %70 : vector<128x128xi1>
    %72 = arith.extui %71 : vector<128x128xi1> to vector<128x128xi32>
    %73 = arith.sitofp %72 : vector<128x128xi32> to vector<128x128xf32>
    %74 = arith.truncf %73 : vector<128x128xf32> to vector<128x128xbf16>
    %cst_21 = arith.constant dense<0.000000e+00> : vector<1x128xf32>
    %75 = tpu.matmul %3, %74, %cst_21 {dimension_numbers = #tpu.dot_dimension_numbers<[1], [0], [0], [1], [0, 0, 1, 1], [], []>} : vector<1x128xbf16>, vector<128x128xbf16>, vector<1x128xf32> -> vector<1x128xf32>
    %c4 = arith.constant 4 : index
    %c0_22 = arith.constant 0 : index
    %76 = vector.load %arg1[%c4, %c0_22] : memref<8x128xf32, #tpu.memory_space<vmem>>, vector<1x128xf32>
    %c4_23 = arith.constant 4 : index
    %c0_24 = arith.constant 0 : index
    %c0_25 = arith.constant 0 : index
    %77 = vector.load %arg2[%c4_23, %c0_24, %c0_25] : memref<8x128x1xf32, #tpu.memory_space<vmem>>, vector<1x128x1xf32>
    %78 = vector.shape_cast %77 : vector<1x128x1xf32> to vector<128x1xf32>
    %79 = vector.broadcast %78 : vector<128x1xf32> to vector<128x128xf32>
    %80 = vector.broadcast %76 : vector<1x128xf32> to vector<128x128xf32>
    %81 = arith.cmpf ogt, %79, %80 : vector<128x128xf32>
    %82 = vector.broadcast %78 : vector<128x1xf32> to vector<128x128xf32>
    %83 = vector.broadcast %76 : vector<1x128xf32> to vector<128x128xf32>
    %84 = arith.cmpf oeq, %82, %83 : vector<128x128xf32>
    %85 = vector.broadcast %2 : vector<128x1xi32> to vector<128x128xi32>
    %86 = vector.broadcast %1 : vector<1x128xi32> to vector<128x128xi32>
    %87 = arith.cmpi slt, %85, %86 : vector<128x128xi32>
    %88 = arith.andi %84, %87 : vector<128x128xi1>
    %89 = arith.ori %81, %88 : vector<128x128xi1>
    %90 = arith.extui %89 : vector<128x128xi1> to vector<128x128xi32>
    %91 = arith.sitofp %90 : vector<128x128xi32> to vector<128x128xf32>
    %92 = arith.truncf %91 : vector<128x128xf32> to vector<128x128xbf16>
    %cst_26 = arith.constant dense<0.000000e+00> : vector<1x128xf32>
    %93 = tpu.matmul %3, %92, %cst_26 {dimension_numbers = #tpu.dot_dimension_numbers<[1], [0], [0], [1], [0, 0, 1, 1], [], []>} : vector<1x128xbf16>, vector<128x128xbf16>, vector<1x128xf32> -> vector<1x128xf32>
    %c5 = arith.constant 5 : index
    %c0_27 = arith.constant 0 : index
    %94 = vector.load %arg1[%c5, %c0_27] : memref<8x128xf32, #tpu.memory_space<vmem>>, vector<1x128xf32>
    %c5_28 = arith.constant 5 : index
    %c0_29 = arith.constant 0 : index
    %c0_30 = arith.constant 0 : index
    %95 = vector.load %arg2[%c5_28, %c0_29, %c0_30] : memref<8x128x1xf32, #tpu.memory_space<vmem>>, vector<1x128x1xf32>
    %96 = vector.shape_cast %95 : vector<1x128x1xf32> to vector<128x1xf32>
    %97 = vector.broadcast %96 : vector<128x1xf32> to vector<128x128xf32>
    %98 = vector.broadcast %94 : vector<1x128xf32> to vector<128x128xf32>
    %99 = arith.cmpf ogt, %97, %98 : vector<128x128xf32>
    %100 = vector.broadcast %96 : vector<128x1xf32> to vector<128x128xf32>
    %101 = vector.broadcast %94 : vector<1x128xf32> to vector<128x128xf32>
    %102 = arith.cmpf oeq, %100, %101 : vector<128x128xf32>
    %103 = vector.broadcast %2 : vector<128x1xi32> to vector<128x128xi32>
    %104 = vector.broadcast %1 : vector<1x128xi32> to vector<128x128xi32>
    %105 = arith.cmpi slt, %103, %104 : vector<128x128xi32>
    %106 = arith.andi %102, %105 : vector<128x128xi1>
    %107 = arith.ori %99, %106 : vector<128x128xi1>
    %108 = arith.extui %107 : vector<128x128xi1> to vector<128x128xi32>
    %109 = arith.sitofp %108 : vector<128x128xi32> to vector<128x128xf32>
    %110 = arith.truncf %109 : vector<128x128xf32> to vector<128x128xbf16>
    %cst_31 = arith.constant dense<0.000000e+00> : vector<1x128xf32>
    %111 = tpu.matmul %3, %110, %cst_31 {dimension_numbers = #tpu.dot_dimension_numbers<[1], [0], [0], [1], [0, 0, 1, 1], [], []>} : vector<1x128xbf16>, vector<128x128xbf16>, vector<1x128xf32> -> vector<1x128xf32>
    %c6 = arith.constant 6 : index
    %c0_32 = arith.constant 0 : index
    %112 = vector.load %arg1[%c6, %c0_32] : memref<8x128xf32, #tpu.memory_space<vmem>>, vector<1x128xf32>
    %c6_33 = arith.constant 6 : index
    %c0_34 = arith.constant 0 : index
    %c0_35 = arith.constant 0 : index
    %113 = vector.load %arg2[%c6_33, %c0_34, %c0_35] : memref<8x128x1xf32, #tpu.memory_space<vmem>>, vector<1x128x1xf32>
    %114 = vector.shape_cast %113 : vector<1x128x1xf32> to vector<128x1xf32>
    %115 = vector.broadcast %114 : vector<128x1xf32> to vector<128x128xf32>
    %116 = vector.broadcast %112 : vector<1x128xf32> to vector<128x128xf32>
    %117 = arith.cmpf ogt, %115, %116 : vector<128x128xf32>
    %118 = vector.broadcast %114 : vector<128x1xf32> to vector<128x128xf32>
    %119 = vector.broadcast %112 : vector<1x128xf32> to vector<128x128xf32>
    %120 = arith.cmpf oeq, %118, %119 : vector<128x128xf32>
    %121 = vector.broadcast %2 : vector<128x1xi32> to vector<128x128xi32>
    %122 = vector.broadcast %1 : vector<1x128xi32> to vector<128x128xi32>
    %123 = arith.cmpi slt, %121, %122 : vector<128x128xi32>
    %124 = arith.andi %120, %123 : vector<128x128xi1>
    %125 = arith.ori %117, %124 : vector<128x128xi1>
    %126 = arith.extui %125 : vector<128x128xi1> to vector<128x128xi32>
    %127 = arith.sitofp %126 : vector<128x128xi32> to vector<128x128xf32>
    %128 = arith.truncf %127 : vector<128x128xf32> to vector<128x128xbf16>
    %cst_36 = arith.constant dense<0.000000e+00> : vector<1x128xf32>
    %129 = tpu.matmul %3, %128, %cst_36 {dimension_numbers = #tpu.dot_dimension_numbers<[1], [0], [0], [1], [0, 0, 1, 1], [], []>} : vector<1x128xbf16>, vector<128x128xbf16>, vector<1x128xf32> -> vector<1x128xf32>
    %c7 = arith.constant 7 : index
    %c0_37 = arith.constant 0 : index
    %130 = vector.load %arg1[%c7, %c0_37] : memref<8x128xf32, #tpu.memory_space<vmem>>, vector<1x128xf32>
    %c7_38 = arith.constant 7 : index
    %c0_39 = arith.constant 0 : index
    %c0_40 = arith.constant 0 : index
    %131 = vector.load %arg2[%c7_38, %c0_39, %c0_40] : memref<8x128x1xf32, #tpu.memory_space<vmem>>, vector<1x128x1xf32>
    %132 = vector.shape_cast %131 : vector<1x128x1xf32> to vector<128x1xf32>
    %133 = vector.broadcast %132 : vector<128x1xf32> to vector<128x128xf32>
    %134 = vector.broadcast %130 : vector<1x128xf32> to vector<128x128xf32>
    %135 = arith.cmpf ogt, %133, %134 : vector<128x128xf32>
    %136 = vector.broadcast %132 : vector<128x1xf32> to vector<128x128xf32>
    %137 = vector.broadcast %130 : vector<1x128xf32> to vector<128x128xf32>
    %138 = arith.cmpf oeq, %136, %137 : vector<128x128xf32>
    %139 = vector.broadcast %2 : vector<128x1xi32> to vector<128x128xi32>
    %140 = vector.broadcast %1 : vector<1x128xi32> to vector<128x128xi32>
    %141 = arith.cmpi slt, %139, %140 : vector<128x128xi32>
    %142 = arith.andi %138, %141 : vector<128x128xi1>
    %143 = arith.ori %135, %142 : vector<128x128xi1>
    %144 = arith.extui %143 : vector<128x128xi1> to vector<128x128xi32>
    %145 = arith.sitofp %144 : vector<128x128xi32> to vector<128x128xf32>
    %146 = arith.truncf %145 : vector<128x128xf32> to vector<128x128xbf16>
    %cst_41 = arith.constant dense<0.000000e+00> : vector<1x128xf32>
    %147 = tpu.matmul %3, %146, %cst_41 {dimension_numbers = #tpu.dot_dimension_numbers<[1], [0], [0], [1], [0, 0, 1, 1], [], []>} : vector<1x128xbf16>, vector<128x128xbf16>, vector<1x128xf32> -> vector<1x128xf32>
    %148 = tpu.concatenate %21, %39, %57, %75, %93, %111, %129, %147 in 0 : vector<1x128xf32>, vector<1x128xf32>, vector<1x128xf32>, vector<1x128xf32>, vector<1x128xf32>, vector<1x128xf32>, vector<1x128xf32>, vector<1x128xf32> -> vector<8x128xf32>
    %cst_42 = arith.constant 2.500000e+01 : f32
    %149 = vector.broadcast %cst_42 : f32 to vector<8x128xf32>
    %150 = arith.cmpf olt, %148, %149 : vector<8x128xf32>
    %cst_43 = arith.constant 0.000000e+00 : f32
    %151 = vector.broadcast %cst_43 : f32 to vector<8x128xf32>
    %152 = arith.select %150, %0, %151 : vector<8x128xi1>, vector<8x128xf32>
    %c0_44 = arith.constant 0 : index
    %c0_45 = arith.constant 0 : index
    %153 = vector.load %arg3[%c0_44, %c0_45] : memref<8x128xf32, #tpu.memory_space<vmem>>, vector<8x128xf32>
    tpu.vector_store %arg3[%c0_44, %c0_45], %152 {strides = array<i32>} : memref<8x128xf32, #tpu.memory_space<vmem>>, vector<8x128xf32>,
    return
  }
  func.func @transform_0(%arg0: i32) -> (i32, i32) {
    %c0_i32 = arith.constant 0 : i32
    %c0_i32_0 = arith.constant 0 : i32
    return %arg0, %c0_i32 : i32, i32
  }
  func.func @transform_1(%arg0: i32) -> (i32, i32, i32) {
    %c0_i32 = arith.constant 0 : i32
    %c0_i32_0 = arith.constant 0 : i32
    %c0_i32_1 = arith.constant 0 : i32
    return %arg0, %c0_i32, %c0_i32_0 : i32, i32, i32
  }
  func.func @transform_2(%arg0: i32) -> (i32, i32) {
    %c0_i32 = arith.constant 0 : i32
    %c0_i32_0 = arith.constant 0 : i32
    return %arg0, %c0_i32 : i32, i32
  }
}

</mosaic_0001>

<bundles_post_ra>
// kernel: tpu_custom_call.1
= control target key start
LH: loop header
LB: loop body
LE: loop exit
PB: predicated region body
PF: predicated region fallthrough
CT: control target
= control target key end

     0   :  { %v2239_v3 = vmov 0   ;;  %s4546_s0 = inlined_call_operand.vmem [shape: f32[8,128], index: 0, kind: input, shape index: {}]   ;;  %s4547_s1 = inlined_call_operand.vmem [shape: f32[8,128,1], index: 1, kind: input, shape index: {}]   ;;  %s4548_s2 = inlined_call_operand.hbm [shape: f32[8,128], index: 2, kind: output, shape index: {}]  }
   0x1   :  { %v38_v0 = vld [vmem:[%s4547_s1 + $0x20] sm:$0xff]  ;;  %v36_v1 = vld [vmem:[%s4547_s1 + $0x10] sm:$0xff]  ;;  %2204 = vset.pattern.permute.xlu2 %v2239_v3  ;;  %2203 = vset.pattern.permute.xlu1 %v2239_v3  ;;  %v39_v4 = vld [vmem:[%s4547_s1 + $0x28] sm:$0xff] }
   0x2   :  { %v34_v2 = vld [vmem:[%s4547_s1] sm:$0xff]  ;;  %2202 = vset.pattern.permute.xlu0 %v2239_v3  ;;  %72 = vperm.xlu2 %2204, %v38_v0   ;;  %v37_v5 = vld [vmem:[%s4547_s1 + $0x18] sm:$0xff]  ;;  %v35_v6 = vld [vmem:[%s4547_s1 + $0x8] sm:$0xff] }
   0x3   :  { %62 = vperm.xlu1 %2203, %v36_v1   ;;  %52 = vperm.xlu0 %2202, %v34_v2  }
   0x4   :  { %7 = vsyncpa [#allocation3], 0  ;;  %v42_v7 = vld [vmem:[%s4547_s1 + $0x40] sm:$0xff]  ;;  %v41_v8 = vld [vmem:[%s4547_s1 + $0x38] sm:$0xff]  ;;  %v14_v3 = vlaneseq  ;;  %s2242_s28 = smov [#allocation2]   ;;  %s1821_s4 = sshll.u32 %s4548_s2, 4  ;;  %s1822_s4 = int_to_ptr.hbm [resolvable:$true] %s1821_s4 }
   0x5   :  { %v40_v9 = vld [vmem:[%s4547_s1 + $0x30] sm:$0xff]  ;;  %v45_v10 = vld [vmem:[%s4547_s1 + $0x58] sm:$0xff]  ;;  %v43_v12 = vld [vmem:[%s4547_s1 + $0x48] sm:$0xff]  ;;  %s1819_s29 = sshll.u32 %s2242_s28, 4  ;;  %s1820_s29 = int_to_ptr.vmem [resolvable:$true] %s1819_s29 }
   0x6   :  { %v44_v11 = vld [vmem:[%s4547_s1 + $0x50] sm:$0xff]  ;;  %v47_v14 = vld [vmem:[%s4547_s1 + $0x68] sm:$0xff]  ;;  %v46_v15 = vld [vmem:[%s4547_s1 + $0x60] sm:$0xff] }
   0x7   :  { %v48_v13 = vld [vmem:[%s4547_s1 + $0x70] sm:$0xff]  ;;  %v1863_v16 = vld [vmem:[%s4547_s1 + $0x88] sm:$0xff]  ;;  %v1862_v17 = vld [vmem:[%s4547_s1 + $0x80] sm:$0xff] }
   0x8   :  { %v49_v18 = vld [vmem:[%s4547_s1 + $0x78] sm:$0xff]  ;;  %v1866_v19 = vld [vmem:[%s4547_s1 + $0xa0] sm:$0xff]  ;;  %v1864_v21 = vld [vmem:[%s4547_s1 + $0x90] sm:$0xff] }
   0x9   :  { %v1865_v20 = vld [vmem:[%s4547_s1 + $0x98] sm:$0xff]  ;;  %v1868_v23 = vld [vmem:[%s4547_s1 + $0xb0] sm:$0xff]  ;;  %v1867_v24 = vld [vmem:[%s4547_s1 + $0xa8] sm:$0xff] }
   0xa   :  { %77 = vperm.xlu2 %2204, %v39_v4   ;;  %v1869_v22 = vld [vmem:[%s4547_s1 + $0xb8] sm:$0xff]  ;;  %v1872_v25 = vld [vmem:[%s4547_s1 + $0xd0] sm:$0xff]  ;;  %v1871_v26 = vld [vmem:[%s4547_s1 + $0xc8] sm:$0xff] }
   0xb   :  { %67 = vperm.xlu1 %2203, %v37_v5   ;;  %57 = vperm.xlu0 %2202, %v35_v6   ;;  %v1870_v27 = vld [vmem:[%s4547_s1 + $0xc0] sm:$0xff]  ;;  %v1875_v28 = vld [vmem:[%s4547_s1 + $0xe8] sm:$0xff]  ;;  %v1873_v30 = vld [vmem:[%s4547_s1 + $0xd8] sm:$0xff]  ;;  %v2446_v5 = vshrl.u32 %v14_v3, 7 }
   0xc   :  { %v1874_v29 = vld [vmem:[%s4547_s1 + $0xe0] sm:$0xff]  ;;  %v1877_v32 = vld [vmem:[%s4547_s1 + $0xf8] sm:$0xff]  ;;  %v1876_v33 = vld [vmem:[%s4547_s1 + $0xf0] sm:$0xff] }
   0xd   :  { %v1910_v31 = vld [vmem:[%s4547_s1 + $0x100] sm:$0xff]  ;;  %v1913_v34 = vld [vmem:[%s4547_s1 + $0x118] sm:$0xff]  ;;  %v1912_v35 = vld [vmem:[%s4547_s1 + $0x110] sm:$0xff] }
   0xe   :  { %v1911_v36 = vld [vmem:[%s4547_s1 + $0x108] sm:$0xff]  ;;  %v1916_v38 = vld [vmem:[%s4547_s1 + $0x130] sm:$0xff]  ;;  %v1914_v40 = vld [vmem:[%s4547_s1 + $0x120] sm:$0xff] }
   0xf   :  { %v1915_v39 = vld [vmem:[%s4547_s1 + $0x128] sm:$0xff]  ;;  %v1918_v43 = vld [vmem:[%s4547_s1 + $0x140] sm:$0xff]  ;;  %v1917_v44 = vld [vmem:[%s4547_s1 + $0x138] sm:$0xff] }
  0x10   :  { %v1919_v42 = vld [vmem:[%s4547_s1 + $0x148] sm:$0xff]  ;;  %v1922_v46 = vld [vmem:[%s4547_s1 + $0x160] sm:$0xff]  ;;  %v1921_v47 = vld [vmem:[%s4547_s1 + $0x158] sm:$0xff] }
  0x11   :  { %v1920_v48 = vld [vmem:[%s4547_s1 + $0x150] sm:$0xff]  ;;  %v1925_v52 = vld [vmem:[%s4547_s1 + $0x178] sm:$0xff]  ;;  %v1923_v54 = vld [vmem:[%s4547_s1 + $0x168] sm:$0xff] }
  0x12   :  { %92 = vperm.xlu2 %2204, %v42_v7   ;;  %v1924_v53 = vld [vmem:[%s4547_s1 + $0x170] sm:$0xff]  ;;  %v1959_v59 = vld [vmem:[%s4547_s1 + $0x188] sm:$0xff]  ;;  %v1958_v60 = vld [vmem:[%s4547_s1 + $0x180] sm:$0xff] }
  0x13   :  { %87 = vperm.xlu1 %2203, %v41_v8   ;;  %82 = vperm.xlu0 %2202, %v40_v9   ;;  %v1960_v58 = vld [vmem:[%s4547_s1 + $0x190] sm:$0xff]  ;;  %v1963_v0 = vld [vmem:[%s4547_s1 + $0x1a8] sm:$0xff]  ;;  %v1962_v1 = vld [vmem:[%s4547_s1 + $0x1a0] sm:$0xff]  ;;  %v31_v9 = vadd.s32 112, %v2446_v5 }
  0x14   :  { %v1961_v2 = vld [vmem:[%s4547_s1 + $0x198] sm:$0xff]  ;;  %v1966_v8 = vld [vmem:[%s4547_s1 + $0x1c0] sm:$0xff] }
  0x1a   :  { %107 = vperm.xlu2 %2204, %v45_v10   ;;  %v1965_v10 = vld [vmem:[%s4547_s1 + $0x1b8] sm:$0xff] }
  0x1b   :  { %102 = vperm.xlu1 %2203, %v44_v11   ;;  %97 = vperm.xlu0 %2202, %v43_v12   ;;  %v1964_v11 = vld [vmem:[%s4547_s1 + $0x1b0] sm:$0xff]  ;;  %v2462_v12 = vand.u32 127, %v14_v3  ;;  %v1970_v3 = vld [vmem:[%s4547_s1 + $0x1e0] sm:$0xff] }
  0x1d   :  { %vm2480_vm1 = vcmp.lt.s32.totalorder %v31_v9, %v2462_v12  ;;  %v4657_v9 = vmov 0 }
  0x22   :  { %122 = vperm.xlu2 %2204, %v48_v13   ;;  %v2467_v13 = vld [vmem:[%s4546_s0] ss:$0 sm:$0xff] }
  0x23   :  { %117 = vperm.xlu1 %2203, %v47_v14   ;;  %112 = vperm.xlu0 %2202, %v46_v15   ;;  %v28_v14 = vadd.s32 88, %v2446_v5  ;;  %v2473_v15 = vld [vmem:[%s4546_s0 + $0x1] ss:$0 sm:$0xff] }
  0x25   :  { %vm2491_vm3 = vcmp.lt.s32.totalorder %v28_v14, %v2462_v12  ;;  %v4662_v14 = vmov 0 }
  0x2a   :  { %289 = vperm.xlu2 %2204, %v1863_v16   ;;  %v25_v16 = vadd.s32 64, %v2446_v5 }
  0x2b   :  { %284 = vperm.xlu1 %2203, %v1862_v17   ;;  %127 = vperm.xlu0 %2202, %v49_v18   ;;  %v29_v17 = vadd.s32 96, %v2446_v5  ;;  %v4610_v18 = vmov 0 }
  0x2c   :  { %v4611_v18 = vsel %vm2480_vm1, 4294967295, %v4610_v18  ;;  %vm2513_vm8 = vcmp.lt.s32.totalorder %v25_v16, %v2462_v12 }
  0x2d   :  { %vm2519_vm10 = vcmp.lt.s32.totalorder %v29_v17, %v2462_v12  ;;  %v4665_v17 = vmov 0 }
  0x32   :  { %304 = vperm.xlu2 %2204, %v1866_v19   ;;  %v18_v19 = vadd.s32 8, %v2446_v5 }
  0x33   :  { %299 = vperm.xlu1 %2203, %v1865_v20   ;;  %294 = vperm.xlu0 %2202, %v1864_v21   ;;  %v30_v21 = vadd.s32 104, %v2446_v5 }
  0x34   :  { %vm2533_vm12 = vcmp.lt.s32.totalorder %v18_v19, %v2462_v12  ;;  %v24_v19 = vadd.s32 56, %v2446_v5 }
  0x35   :  { %vm2539_vm14 = vcmp.lt.s32.totalorder %v30_v21, %v2462_v12  ;;  %v4670_v21 = vmov 0 }
  0x3a   :  { %319 = vperm.xlu2 %2204, %v1869_v22   ;;  %v4612_v22 = vmov 0 }
  0x3b   :  { %314 = vperm.xlu1 %2203, %v1868_v23   ;;  %309 = vperm.xlu0 %2202, %v1867_v24   ;;  %v4613_v22 = vsel %vm2491_vm3, 4294967295, %v4612_v22  ;;  %v27_v23 = vadd.s32 80, %v2446_v5 }
  0x42   :  { %334 = vperm.xlu2 %2204, %v1872_v25  }
  0x43   :  { %329 = vperm.xlu1 %2203, %v1871_v26   ;;  %324 = vperm.xlu0 %2202, %v1870_v27   ;;  %v21_v26 = vadd.s32 32, %v2446_v5  ;;  %v2006_v27 = vld [vmem:[%s4547_s1 + $0x200] sm:$0xff] }
  0x45   :  { %vm2575_vm9 = vcmp.lt.s32.totalorder %v21_v26, %v2462_v12  ;;  %v4675_v26 = vmov 0 }
  0x4a   :  { %349 = vperm.xlu2 %2204, %v1875_v28   ;;  %v4616_v28 = vmov 0 }
  0x4b   :  { %344 = vperm.xlu1 %2203, %v1874_v29   ;;  %339 = vperm.xlu0 %2202, %v1873_v30   ;;  %v4617_v28 = vsel %vm2513_vm8, 4294967295, %v4616_v28  ;;  %v4618_v29 = vmov 0  ;;  %v1969_v30 = vld [vmem:[%s4547_s1 + $0x1d8] sm:$0xff] }
  0x4c   :  { %v4619_v29 = vsel %vm2519_vm10, 4294967295, %v4618_v29 }
  0x52   :  { %500 = vperm.xlu2 %2204, %v1910_v31  }
  0x53   :  { %359 = vperm.xlu1 %2203, %v1877_v32   ;;  %354 = vperm.xlu0 %2202, %v1876_v33   ;;  %v4622_v32 = vmov 0  ;;  %v4624_v33 = vmov 0 }
  0x54   :  { %v4623_v32 = vsel %vm2533_vm12, 4294967295, %v4622_v32  ;;  %v4625_v33 = vsel %vm2539_vm14, 4294967295, %v4624_v33 }
  0x5a   :  { %515 = vperm.xlu2 %2204, %v1913_v34   ;;  %v1968_v34 = vld [vmem:[%s4547_s1 + $0x1d0] sm:$0xff] }
  0x5b   :  { %510 = vperm.xlu1 %2203, %v1912_v35   ;;  %505 = vperm.xlu0 %2202, %v1911_v36   ;;  %v1967_v35 = vld [vmem:[%s4547_s1 + $0x1c8] sm:$0xff]  ;;  %v4626_v36 = vmov 0 }
  0x5c   :  { %v2366_v37 = vpop.permute.xlu2 %72 }
  0x62   :  { %530 = vperm.xlu2 %2204, %v1916_v38   ;;  %v4628_v38 = vmov 0 }
  0x63   :  { %525 = vperm.xlu1 %2203, %v1915_v39   ;;  %520 = vperm.xlu0 %2202, %v1914_v40   ;;  %v32_v39 = vadd.s32 120, %v2446_v5  ;;  %v4630_v40 = vmov 0 }
  0x64   :  { %v2377_v41 = vpop.permute.xlu2 %77 }
  0x6a   :  { %545 = vperm.xlu2 %2204, %v1919_v42   ;;  %v4632_v42 = vmov 0 }
  0x6b   :  { %540 = vperm.xlu1 %2203, %v1918_v43   ;;  %535 = vperm.xlu0 %2202, %v1917_v44   ;;  %v4633_v42 = vsel %vm2575_vm9, 4294967295, %v4632_v42  ;;  %v2008_v43 = vld [vmem:[%s4547_s1 + $0x210] sm:$0xff]  ;;  %v4692_v44 = vmov 0 }
  0x6c   :  { %v2388_v45 = vpop.permute.xlu2 %92 }
  0x6d   :  { %vm155_vm7 = vcmp.eq.f32.partialorder %v2388_v45, %v2467_v13 }
  0x72   :  { %560 = vperm.xlu2 %2204, %v1922_v46  }
  0x73   :  { %555 = vperm.xlu1 %2203, %v1921_v47   ;;  %550 = vperm.xlu0 %2202, %v1920_v48   ;;  %v4642_v48 = vmov 0 }
  0x74   :  { %v2399_v49 = vpop.permute.xlu2 %107 }
  0x75   :  { %v2401_v50 = vpop.permute.xlu1 %62  ;;  %v2403_v51 = vpop.permute.xlu0 %52  ;;  %vm158_vm2 = vcmp.eq.f32.partialorder %v2399_v49, %v2467_v13 }
  0x76   :  { %vm2528_vm11 = vmand %vm158_vm2, %vm2491_vm3  ;;  %vm2558_vm2 = vcmp.lt.s32.totalorder %v27_v23, %v2462_v12 }
  0x77   :  { %v4629_v38 = vsel %vm2558_vm2, 4294967295, %v4628_v38  ;;  %vm2584_vm3 = vmand %vm155_vm7, %vm2513_vm8 }
  0x7a   :  { %575 = vperm.xlu2 %2204, %v1925_v52   ;;  %v22_v52 = vadd.s32 40, %v2446_v5 }
  0x7b   :  { %570 = vperm.xlu1 %2203, %v1924_v53   ;;  %565 = vperm.xlu0 %2202, %v1923_v54   ;;  %v4644_v53 = vmov 0 }
  0x7c   :  { %v2414_v55 = vpop.permute.xlu2 %122 }
  0x7d   :  { %v2416_v56 = vpop.permute.xlu1 %67  ;;  %v2418_v57 = vpop.permute.xlu0 %57  ;;  %vm161_vm0 = vcmp.eq.f32.partialorder %v2414_v55, %v2467_v13  ;;  %vm145_vm4 = vcmp.gt.f32.partialorder %v2414_v55, %v2467_v13 }
  0x7e   :  { %vm2506_vm6 = vmand %vm161_vm0, %vm2480_vm1 }
  0x7f   :  { %vm2568_vm13 = vmor %vm145_vm4, %vm2506_vm6 }
  0x80   :  { %v4631_v40 = vsel %vm2568_vm13, 4294967295, %v4630_v40 }
  0x82   :  { %726 = vperm.xlu2 %2204, %v1960_v58   ;;  %v4646_v58 = vmov 0 }
  0x83   :  { %721 = vperm.xlu1 %2203, %v1959_v59   ;;  %716 = vperm.xlu0 %2202, %v1958_v60   ;;  %v2014_v60 = vld [vmem:[%s4547_s1 + $0x240] sm:$0xff] }
  0x84   :  { %v2429_v61 = vpop.permute.xlu2 %289 }
  0x85   :  { %v2431_v62 = vpop.permute.xlu1 %87  ;;  %v2433_v63 = vpop.permute.xlu0 %82  ;;  %vm380_vm5 = vcmp.eq.f32.partialorder %v2429_v61, %v2473_v15 }
  0x86   :  { %vm2551_vm15 = vmand %vm380_vm5, %vm2533_vm12  ;;  %vm151_vm5 = vcmp.eq.f32.partialorder %v2366_v37, %v2467_v13  ;;  %vm142_vm12 = vcmp.gt.f32.partialorder %v2399_v49, %v2467_v13  ;;  %v1972_v49 = vld [vmem:[%s4547_s1 + $0x1f0] sm:$0xff] }
  0x87   :  { %v4627_v36 = vsel %vm2551_vm15, 4294967295, %v4626_v36 }
  0x8a   :  { %741 = vperm.xlu2 %2204, %v1963_v0  }
  0x8b   :  { %736 = vperm.xlu1 %2203, %v1962_v1   ;;  %731 = vperm.xlu0 %2202, %v1961_v2   ;;  %v1971_v1 = vld [vmem:[%s4547_s1 + $0x1e8] sm:$0xff]  ;;  %v26_v2 = vadd.s32 72, %v2446_v5 }
  0x8c   :  { %v2444_v4 = vpop.permute.xlu2 %304 }
  0x8d   :  { %v2448_v6 = vpop.permute.xlu1 %102  ;;  %v2450_v7 = vpop.permute.xlu0 %97 }
  0x8e   :  { %vm157_vm0 = vcmp.eq.f32.partialorder %v2448_v6, %v2467_v13 }
  0x8f   :  { %vm2604_vm7 = vmand %vm157_vm0, %vm2558_vm2  ;;  %vm2624_vm0 = vcmp.lt.s32.totalorder %v32_v39, %v2462_v12  ;;  %v2009_v39 = vld [vmem:[%s4547_s1 + $0x218] sm:$0xff] }
  0x90   :  { %v4647_v58 = vsel %vm2624_vm0, 4294967295, %v4646_v58 }
  0x92   :  { %756 = vperm.xlu2 %2204, %v1966_v8   ;;  %v4705_v8 = vmov 0 }
  0x93   :  { %751 = vperm.xlu1 %2203, %v1965_v10   ;;  %746 = vperm.xlu0 %2202, %v1964_v11   ;;  %v23_v10 = vadd.s32 48, %v2446_v5  ;;  %v2240_v11 = vmov 1.0|1.0  }
  0x94   :  { %v2485_v20 = vpop.permute.xlu2 %319 }
  0x95   :  { %v118_v24 = vpop.permute.xlu1 %117  ;;  %v113_v25 = vpop.permute.xlu0 %112 }
  0x96   :  { %vm143_vm4 = vcmp.gt.f32.partialorder %v113_v25, %v2467_v13  ;;  %vm4636_vm6 = vcmp.eq.f32.partialorder %v113_v25, %v2467_v13  ;;  %vm4637_vm15 = vcmp.eq.f32.partialorder %v118_v24, %v2467_v13  ;;  %vm4650_vm2 = vcmp.gt.f32.partialorder %v118_v24, %v2467_v13 }
  0x97   :  { %vm191_vm1 = vmand %vm4636_vm6, %vm2519_vm10  ;;  %v4797_v25 = vmov 0 }
  0x98   :  { %vm2598_vm13 = vmand %vm4637_vm15, %vm2539_vm14  ;;  %vm2619_vm15 = vcmp.lt.s32.totalorder %v2446_v5, %v2462_v12 }
  0x99   :  { %vm2612_vm6 = vmand %vm151_vm5, %vm2575_vm9  ;;  %v4645_v53 = vsel %vm2619_vm15, 4294967295, %v4644_v53 }
  0x9a   :  { %771 = vperm.xlu2 %2204, %v1969_v30   ;;  %v4643_v48 = vsel %vm2612_vm6, 4294967295, %v4642_v48  ;;  %vm2630_vm5 = vmor %vm143_vm4, %vm191_vm1  ;;  %vm2677_vm4 = vcmp.lt.s32.totalorder %v22_v52, %v2462_v12  ;;  %v2013_v52 = vld [vmem:[%s4547_s1 + $0x238] sm:$0xff]  ;;  %v2054_v30 = vld [vmem:[%s4547_s1 + $0x280] sm:$0xff] }
  0x9b   :  { %766 = vperm.xlu1 %2203, %v1968_v34   ;;  %761 = vperm.xlu0 %2202, %v1967_v35   ;;  %vm2643_vm14 = vmor %vm4650_vm2, %vm2598_vm13  ;;  %v4658_v9 = vsel %vm2677_vm4, 4294967295, %v4657_v9 }
  0x9c   :  { %v2608_v47 = vpop.permute.xlu2 %334  ;;  %vm2670_vm2 = vmor %vm142_vm12, %vm2528_vm11  ;;  %vm4660_vm11 = vnez %v4627_v36  ;;  %vm4661_vm12 = vcmp.gt.f32.partialorder %v2429_v61, %v2473_v15  ;;  %v2065_v61 = vld [vmem:[%s4547_s1 + $0x2d8] sm:$0xff] }
  0x9d   :  { %v285_v54 = vpop.permute.xlu1 %284  ;;  %v128_v55 = vpop.permute.xlu0 %127 }
  0x9e   :  { %vm379_vm8 = vcmp.eq.f32.partialorder %v285_v54, %v2473_v15  ;;  %vm146_vm9 = vcmp.gt.f32.partialorder %v128_v55, %v2467_v13  ;;  %vm162_vm10 = vcmp.eq.f32.partialorder %v128_v55, %v2467_v13 }
  0x9f   :  { %vm2649_vm1 = vmand %vm379_vm8, %vm2619_vm15  ;;  %vm136_vm15 = vcmp.gt.f32.partialorder %v2377_v41, %v2467_v13 }
  0xa0   :  { %vm194_vm6 = vmand %vm162_vm10, %vm2624_vm0  ;;  %vm2747_vm0 = vcmp.lt.s32.totalorder %v23_v10, %v2462_v12  ;;  %v2019_v10 = vld [vmem:[%s4547_s1 + $0x268] sm:$0xff] }
  0xa1   :  { %vm210_vm13 = vmor %vm146_vm9, %vm194_vm6  ;;  %vm4659_vm6 = vnez %v4631_v40  ;;  %v4676_v26 = vsel %vm2747_vm0, 4294967295, %v4675_v26  ;;  %v2056_v40 = vld [vmem:[%s4547_s1 + $0x290] sm:$0xff] }
  0xa2   :  { %vm1846_vm8 = vmpackc.low %vm210_vm13, %vm4659_vm6  ;;  %786 = vperm.xlu2 %2204, %v1972_v49  }
  0xa3   :  { %1847 = vmatpush.bf16.msk.msra.mxu0 %vm1846_vm8, %v2240_v11  ;;  %781 = vperm.xlu1 %2203, %v1971_v1   ;;  %vm2692_vm10 = vmor %vm4661_vm12, %vm4660_vm11  ;;  %vm4664_vm8 = vcmp.gt.f32.partialorder %v285_v54, %v2473_v15  ;;  %vm4667_vm11 = vcmp.eq.f32.partialorder %v2377_v41, %v2467_v13  ;;  %v2010_v41 = vld [vmem:[%s4547_s1 + $0x220] sm:$0xff]  ;;  %v2011_v54 = vld [vmem:[%s4547_s1 + $0x228] sm:$0xff] }
  0xa4   :  { %v4663_v14 = vsel %vm2692_vm10, 4294967295, %v4662_v14  ;;  %776 = vperm.xlu0 %2202, %v1970_v3   ;;  %v2698_v16 = vpop.permute.xlu2 %349  ;;  %vm2704_vm13 = vmor %vm4664_vm8, %vm2649_vm1  ;;  %vm156_vm1 = vcmp.eq.f32.partialorder %v2450_v7, %v2467_v13  ;;  %vm2723_vm8 = vcmp.lt.s32.totalorder %v26_v2, %v2462_v12  ;;  %v4703_v3 = vmov 0 }
  0xa5   :  { %v4666_v17 = vsel %vm2704_vm13, 4294967295, %v4665_v17  ;;  %vm2715_vm12 = vmand %vm4667_vm11, %vm2677_vm4  ;;  %v4671_v21 = vsel %vm2723_vm8, 4294967295, %v4670_v21  ;;  %v2727_v23 = vpop.permute.xlu1 %299  ;;  %v2729_v24 = vpop.permute.xlu0 %294  ;;  %vm4672_vm11 = vcmp.gt.f32.partialorder %v2388_v45, %v2467_v13  ;;  %vm153_vm4 = vcmp.eq.f32.partialorder %v2433_v63, %v2467_v13  ;;  %v2007_v45 = vld [vmem:[%s4547_s1 + $0x208] sm:$0xff] }
  0xa6   :  { %vm2736_vm6 = vmor %vm4672_vm11, %vm2584_vm3  ;;  %vm4677_vm11 = vcmp.gt.f32.partialorder %v2448_v6, %v2467_v13  ;;  %vm140_vm13 = vcmp.gt.f32.partialorder %v2450_v7, %v2467_v13  ;;  %v4682_v7 = vmov 0 }
  0xa7   :  { %vm1848_vm3 = vmpackc.low %vm2643_vm14, %vm2630_vm5  ;;  %vm4678_vm14 = vnez %v4643_v48  ;;  %vm4679_vm5 = vcmp.gt.f32.partialorder %v2366_v37, %v2467_v13  ;;  %v1973_v37 = vld [vmem:[%s4547_s1 + $0x1f8] sm:$0xff] }
  0xa8   :  { %1849 = vmatpush.bf16.msk.msra.mxu0 %vm1848_vm3, %v2240_v11  ;;  %vm205_vm9 = vmor %vm4677_vm11, %vm2604_vm7  ;;  %vm154_vm3 = vcmp.eq.f32.partialorder %v2431_v62, %v2467_v13  ;;  %vm2783_vm11 = vcmp.lt.s32.totalorder %v24_v19, %v2462_v12  ;;  %v2064_v19 = vld [vmem:[%s4547_s1 + $0x2d0] sm:$0xff] }
  0xa9   :  { %vm188_vm10 = vmand %vm156_vm1, %vm2723_vm8  ;;  %v4683_v7 = vsel %vm2783_vm11, 4294967295, %v4682_v7 }
  0xaa   :  { %vm2776_vm7 = vmor %vm4679_vm5, %vm4678_vm14  ;;  %vm137_vm14 = vcmp.gt.f32.partialorder %v2433_v63, %v2467_v13  ;;  %937 = vperm.xlu2 %2204, %v2007_v45   ;;  %v20_v63 = vadd.s32 24, %v2446_v5 }
  0xab   :  { %vm2789_vm1 = vmand %vm153_vm4, %vm2747_vm0  ;;  %932 = vperm.xlu1 %2203, %v2006_v27   ;;  %vm138_vm4 = vcmp.gt.f32.partialorder %v2431_v62, %v2467_v13  ;;  %v19_v62 = vadd.s32 16, %v2446_v5  ;;  %v4690_v5 = vmov 0 }
  0xac   :  { %vm1850_vm5 = vmpackc.low %vm2670_vm2, %vm205_vm9  ;;  %791 = vperm.xlu0 %2202, %v1973_v37   ;;  %v2805_v31 = vpop.permute.xlu2 %500  ;;  %v2021_v37 = vld [vmem:[%s4547_s1 + $0x278] sm:$0xff] }
  0xad   :  { %1851 = vmatpush.bf16.msk.msra.mxu0 %vm1850_vm5, %v2240_v11  ;;  %vm204_vm8 = vmor %vm140_vm13, %vm188_vm10  ;;  %v2810_v34 = vpop.permute.xlu1 %314  ;;  %v2812_v35 = vpop.permute.xlu0 %309 }
  0xae   :  { %vm186_vm0 = vmand %vm154_vm3, %vm2783_vm11  ;;  %vm147_vm3 = vcmp.eq.f32.partialorder %v2403_v51, %v2467_v13 }
  0xaf   :  { %vm2816_vm2 = vmor %vm137_vm14, %vm2789_vm1  ;;  %vm134_vm14 = vcmp.gt.f32.partialorder %v2416_v56, %v2467_v13 }
  0xb0   :  { %vm1852_vm10 = vmpackc.low %vm204_vm8, %vm2736_vm6  ;;  %vm150_vm6 = vcmp.eq.f32.partialorder %v2416_v56, %v2467_v13  ;;  %vm2839_vm8 = vcmp.lt.s32.totalorder %v20_v63, %v2462_v12  ;;  %v2020_v63 = vld [vmem:[%s4547_s1 + $0x270] sm:$0xff]  ;;  %v3112_v56 = vld [vmem:[%s4546_s0 + $0x2] ss:$0 sm:$0xff] }
  0xb1   :  { %1853 = vmatpush.bf16.msk.msra.mxu0 %vm1852_vm10, %v2240_v11  ;;  %vm202_vm9 = vmor %vm138_vm4, %vm186_vm0  ;;  %v4691_v5 = vsel %vm2839_vm8, 4294967295, %v4690_v5  ;;  %vm149_vm0 = vcmp.eq.f32.partialorder %v2401_v50, %v2467_v13  ;;  %vm4694_vm10 = vnez %v4645_v53 }
  0xb2   :  { %vm2832_vm13 = vmor %vm136_vm15, %vm2715_vm12  ;;  %vm2849_vm15 = vcmp.lt.s32.totalorder %v19_v62, %v2462_v12  ;;  %952 = vperm.xlu2 %2204, %v2010_v41  }
  0xb3   :  { %v4693_v44 = vsel %vm2849_vm15, 4294967295, %v4692_v44  ;;  %vm1854_vm12 = vmpackc.low %vm202_vm9, %vm2816_vm2  ;;  %947 = vperm.xlu1 %2203, %v2009_v39   ;;  %vm148_vm2 = vcmp.eq.f32.partialorder %v2418_v57, %v2467_v13  ;;  %v2057_v39 = vld [vmem:[%s4547_s1 + $0x298] sm:$0xff] }
  0xb4   :  { %vm1856_vm1 = vmpackc.low %vm2832_vm13, %vm2776_vm7  ;;  %942 = vperm.xlu0 %2202, %v2008_v43   ;;  %v2866_v12 = vpop.permute.xlu2 %515  ;;  %vm133_vm7 = vcmp.gt.f32.partialorder %v2401_v50, %v2467_v13  ;;  %v2012_v50 = vld [vmem:[%s4547_s1 + $0x230] sm:$0xff]  ;;  %v2055_v43 = vld [vmem:[%s4547_s1 + $0x288] sm:$0xff] }
  0xb5   :  { %1855 = vmatpush.bf16.msk.msra.mxu0 %vm1854_vm12, %v2240_v11  ;;  %vm182_vm5 = vmand %vm150_vm6, %vm2839_vm8  ;;  %v2872_v46 = vpop.permute.xlu1 %329  ;;  %v2874_v48 = vpop.permute.xlu0 %324  ;;  %vm132_vm6 = vcmp.gt.f32.partialorder %v2418_v57, %v2467_v13 }
  0xb6   :  { %vm181_vm4 = vmand %vm149_vm0, %vm2849_vm15  ;;  %vm4697_vm0 = vnez %v4623_v32 }
  0xb7   :  { %vm2880_vm9 = vmand %vm147_vm3, %vm4694_vm10 }
  0xb8   :  { %vm198_vm13 = vmor %vm134_vm14, %vm182_vm5 }
  0xb9   :  { %1857 = vmatpush.bf16.msk.msra.mxu0 %vm1856_vm1, %v2240_v11  ;;  %vm180_vm12 = vmand %vm148_vm2, %vm4697_vm0  ;;  %vm131_vm1 = vcmp.gt.f32.partialorder %v2403_v51, %v2467_v13  ;;  %v2016_v51 = vld [vmem:[%s4547_s1 + $0x250] sm:$0xff]  ;;  %v2015_v13 = vld [vmem:[%s4547_s1 + $0x248] sm:$0xff] }
  0xba   :  { %vm197_vm3 = vmor %vm133_vm7, %vm181_vm4  ;;  %967 = vperm.xlu2 %2204, %v2013_v52   ;;  %vm392_vm7 = vcmp.eq.f32.partialorder %v2698_v16, %v2473_v15 }
  0xbb   :  { %vm1858_vm14 = vmpackc.low %vm198_vm13, %vm197_vm3  ;;  %962 = vperm.xlu1 %2203, %v2012_v50   ;;  %vm376_vm13 = vcmp.gt.f32.partialorder %v2698_v16, %v2473_v15  ;;  %v2017_v16 = vld [vmem:[%s4547_s1 + $0x258] sm:$0xff] }
  0xbc   :  { %vm196_vm5 = vmor %vm132_vm6, %vm180_vm12  ;;  %957 = vperm.xlu0 %2202, %v2011_v54   ;;  %v2901_v57 = vpop.permute.xlu2 %530  ;;  %vm4698_vm6 = vnez %v4625_v33 }
  0xbd   :  { %1859 = vmatpush.bf16.msk.msra.mxu0 %vm1858_vm14, %v2240_v11  ;;  %v345_v55 = vpop.permute.xlu1 %344  ;;  %v340_v59 = vpop.permute.xlu0 %339  ;;  %vm195_vm4 = vmor %vm131_vm1, %vm2880_vm9  ;;  %vm389_vm9 = vcmp.eq.f32.partialorder %v2608_v47, %v2473_v15  ;;  %vm4699_vm1 = vnez %v4629_v38 }
  0xbe   :  { %vm1860_vm2 = vmpackc.low %vm196_vm5, %vm195_vm4  ;;  %vm391_vm3 = vcmp.eq.f32.partialorder %v345_v55, %v2473_v15  ;;  %vm4702_vm5 = vnez %v4619_v29  ;;  %vm375_vm15 = vcmp.gt.f32.partialorder %v345_v55, %v2473_v15  ;;  %v2063_v55 = vld [vmem:[%s4547_s1 + $0x2c8] sm:$0xff] }
  0xbf   :  { %vm408_vm12 = vmand %vm392_vm7, %vm4698_vm6 }
  0xc0   :  { %vm2928_vm14 = vmand %vm389_vm9, %vm4699_vm1  ;;  %vm373_vm9 = vcmp.gt.f32.partialorder %v2608_v47, %v2473_v15  ;;  %v2018_v47 = vld [vmem:[%s4547_s1 + $0x260] sm:$0xff] }
  0xc1   :  { %1861 = vmatpush.bf16.msk.msra.mxu0 %vm1860_vm2, %v2240_v11  ;;  %vm2934_vm4 = vmand %vm391_vm3, %vm4702_vm5  ;;  %vm4707_vm3 = vnez %v4611_v18  ;;  %vm383_vm5 = vcmp.eq.f32.partialorder %v2444_v4, %v2473_v15 }
  0xc2   :  { %982 = vperm.xlu2 %2204, %v2016_v51   ;;  %v4704_v3 = vsel %vm2934_vm4, 4294967295, %v4703_v3  ;;  %vm2941_vm0 = vmor %vm376_vm13, %vm408_vm12  ;;  %vm386_vm13 = vcmp.eq.f32.partialorder %v2485_v20, %v2473_v15  ;;  %vm4708_vm12 = vnez %v4647_v58  ;;  %v2061_v51 = vld [vmem:[%s4547_s1 + $0x2b8] sm:$0xff] }
  0xc3   :  { %977 = vperm.xlu1 %2203, %v2015_v13   ;;  %v4706_v8 = vsel %vm2941_vm0, 4294967295, %v4705_v8  ;;  %vm2969_vm4 = vmor %vm373_vm9, %vm2928_vm14  ;;  %vm4716_vm14 = vnez %v4704_v3  ;;  %vm4717_vm9 = vnez %v4613_v22  ;;  %v4746_v3 = vmov 0  ;;  %v2162_v13 = vld [vmem:[%s4547_s1 + $0x3e0] sm:$0xff] }
  0xc4   :  { %972 = vperm.xlu0 %2202, %v2014_v60   ;;  %v2924_v0 = vpop.permute.xlu2 %545 }
  0xc5   :  { %v360_v1 = vpop.permute.xlu1 %359  ;;  %v355_v2 = vpop.permute.xlu0 %354 }
  0xc6   :  { %vm394_vm2 = vcmp.eq.f32.partialorder %v360_v1, %v2473_v15  ;;  %vm377_vm7 = vcmp.gt.f32.partialorder %v355_v2, %v2473_v15  ;;  %vm393_vm10 = vcmp.eq.f32.partialorder %v355_v2, %v2473_v15  ;;  %vm378_vm6 = vcmp.gt.f32.partialorder %v360_v1, %v2473_v15 }
  0xc7   :  { %vm409_vm1 = vmand %vm393_vm10, %vm4707_vm3  ;;  %vm390_vm3 = vcmp.eq.f32.partialorder %v340_v59, %v2473_v15 }
  0xc8   :  { %vm410_vm8 = vmand %vm394_vm2, %vm4708_vm12  ;;  %vm4711_vm2 = vnez %v4633_v42 }
  0xc9   :  { %vm425_vm10 = vmor %vm377_vm7, %vm409_vm1  ;;  %vm374_vm7 = vcmp.gt.f32.partialorder %v340_v59, %v2473_v15  ;;  %v2062_v59 = vld [vmem:[%s4547_s1 + $0x2c0] sm:$0xff] }
  0xca   :  { %vm426_vm0 = vmor %vm378_vm6, %vm410_vm8  ;;  %997 = vperm.xlu2 %2204, %v2019_v10   ;;  %vm387_vm8 = vcmp.eq.f32.partialorder %v2874_v48, %v2473_v15 }
  0xcb   :  { %vm2975_vm12 = vmand %vm383_vm5, %vm4711_vm2  ;;  %992 = vperm.xlu1 %2203, %v2018_v47   ;;  %vm371_vm2 = vcmp.gt.f32.partialorder %v2874_v48, %v2473_v15 }
  0xcc   :  { %vm2981_vm1 = vmand %vm386_vm13, %vm2783_vm11  ;;  %987 = vperm.xlu0 %2202, %v2017_v16   ;;  %v2988_v45 = vpop.permute.xlu2 %560  ;;  %vm4720_vm11 = vnez %v4671_v21  ;;  %v2066_v16 = vld [vmem:[%s4547_s1 + $0x2e0] sm:$0xff] }
  0xcd   :  { %vm1894_vm6 = vmpackc.low %vm426_vm0, %vm425_vm10  ;;  %v2997_v27 = vpop.permute.xlu1 %510  ;;  %v2999_v6 = vpop.permute.xlu0 %505  ;;  %vm388_vm0 = vcmp.eq.f32.partialorder %v2872_v46, %v2473_v15  ;;  %vm4718_vm10 = vnez %v4617_v28 }
  0xce   :  { %1895 = vmatpush.bf16.msk.msra.mxu1 %vm1894_vm6, %v2240_v11  ;;  %vm423_vm5 = vmor %vm375_vm15, %vm4716_vm14  ;;  %vm4719_vm15 = vnez %v4706_v8  ;;  %v4748_v8 = vmov 0 }
  0xcf   :  { %vm406_vm13 = vmand %vm390_vm3, %vm4717_vm9 }
  0xd0   :  { %vm403_vm6 = vmand %vm387_vm8, %vm4718_vm10  ;;  %vm372_vm8 = vcmp.gt.f32.partialorder %v2872_v46, %v2473_v15 }
  0xd1   :  { %vm1896_vm14 = vmpackc.low %vm4719_vm15, %vm423_vm5  ;;  %vm385_vm5 = vcmp.eq.f32.partialorder %v2810_v34, %v2473_v15 }
  0xd2   :  { %1897 = vmatpush.bf16.msk.msra.mxu1 %vm1896_vm14, %v2240_v11  ;;  %vm422_vm3 = vmor %vm374_vm7, %vm406_vm13  ;;  %1148 = vperm.xlu2 %2204, %v2054_v30   ;;  %vm367_vm7 = vcmp.gt.f32.partialorder %v2444_v4, %v2473_v15  ;;  %vm370_vm13 = vcmp.gt.f32.partialorder %v2485_v20, %v2473_v15  ;;  %v3242_v30 = vld [vmem:[%s4546_s0 + $0x3] ss:$0 sm:$0xff] }
  0xd3   :  { %vm404_vm9 = vmand %vm388_vm0, %vm4720_vm11  ;;  %1007 = vperm.xlu1 %2203, %v2021_v37   ;;  %v4763_v37 = vmov 0 }
  0xd4   :  { %vm3025_vm15 = vmor %vm371_vm2, %vm403_vm6  ;;  %1002 = vperm.xlu0 %2202, %v2020_v63   ;;  %v3036_v62 = vpop.permute.xlu2 %575  ;;  %vm369_vm2 = vcmp.gt.f32.partialorder %v2810_v34, %v2473_v15  ;;  %vm4723_vm6 = vnez %v4676_v26 }
  0xd5   :  { %vm1898_vm0 = vmpackc.low %vm422_vm3, %vm2969_vm4  ;;  %v3042_v4 = vpop.permute.xlu1 %525  ;;  %v3044_v41 = vpop.permute.xlu0 %520  ;;  %vm384_vm4 = vcmp.eq.f32.partialorder %v2812_v35, %v2473_v15 }
  0xd6   :  { %1899 = vmatpush.bf16.msk.msra.mxu1 %vm1898_vm0, %v2240_v11  ;;  %vm420_vm14 = vmor %vm372_vm8, %vm404_vm9  ;;  %vm381_vm8 = vcmp.eq.f32.partialorder %v2729_v24, %v2473_v15  ;;  %vm4729_vm0 = vnez %v4693_v44 }
  0xd7   :  { %vm401_vm10 = vmand %vm385_vm5, %vm4723_vm6 }
  0xd8   :  { %vm3050_vm3 = vmor %vm370_vm13, %vm2981_vm1 }
  0xd9   :  { %vm3056_vm9 = vmor %vm367_vm7, %vm2975_vm12  ;;  %vm368_vm12 = vcmp.gt.f32.partialorder %v2812_v35, %v2473_v15  ;;  %vm4728_vm7 = vnez %v4658_v9 }
  0xda   :  { %vm1900_vm5 = vmpackc.low %vm420_vm14, %vm3025_vm15  ;;  %vm382_vm15 = vcmp.eq.f32.partialorder %v2727_v23, %v2473_v15  ;;  %1163 = vperm.xlu2 %2204, %v2057_v39   ;;  %vm365_vm14 = vcmp.gt.f32.partialorder %v2729_v24, %v2473_v15  ;;  %v2060_v24 = vld [vmem:[%s4547_s1 + $0x2b0] sm:$0xff]  ;;  %v4855_v39 = vmov 0 }
  0xdb   :  { %1901 = vmatpush.bf16.msk.msra.mxu1 %vm1900_vm5, %v2240_v11  ;;  %vm417_vm1 = vmor %vm369_vm2, %vm401_vm10  ;;  %1158 = vperm.xlu1 %2203, %v2056_v40   ;;  %vm366_vm5 = vcmp.gt.f32.partialorder %v2727_v23, %v2473_v15  ;;  %v2059_v15 = vld [vmem:[%s4547_s1 + $0x2a8] sm:$0xff]  ;;  %v2058_v23 = vld [vmem:[%s4547_s1 + $0x2a0] sm:$0xff] }
  0xdc   :  { %vm400_vm13 = vmand %vm384_vm4, %vm4728_vm7  ;;  %1153 = vperm.xlu0 %2202, %v2055_v43   ;;  %v3087_v35 = vpop.permute.xlu2 %726  ;;  %vm4730_vm7 = vnez %v4691_v5  ;;  %v2117_v40 = vld [vmem:[%s4547_s1 + $0x378] sm:$0xff]  ;;  %v2116_v43 = vld [vmem:[%s4547_s1 + $0x370] sm:$0xff] }
  0xdd   :  { %vm397_vm10 = vmand %vm381_vm8, %vm4729_vm0  ;;  %v3093_v46 = vpop.permute.xlu1 %540  ;;  %v3095_v48 = vpop.permute.xlu0 %535 }
  0xde   :  { %vm1902_vm2 = vmpackc.low %vm3050_vm3, %vm417_vm1 }
  0xdf   :  { %1903 = vmatpush.bf16.msk.msra.mxu1 %vm1902_vm2, %v2240_v11  ;;  %vm416_vm4 = vmor %vm368_vm12, %vm400_vm13  ;;  %vm610_vm12 = vcmp.eq.f32.partialorder %v3036_v62, %v3112_v56  ;;  %vm604_vm13 = vcmp.eq.f32.partialorder %v2924_v0, %v3112_v56 }
  0xe0   :  { %vm398_vm8 = vmand %vm382_vm15, %vm4730_vm7  ;;  %vm607_vm15 = vcmp.eq.f32.partialorder %v2988_v45, %v3112_v56 }
  0xe1   :  { %vm413_vm0 = vmor %vm365_vm14, %vm397_vm10  ;;  %vm4731_vm10 = vnez %v4663_v14  ;;  %vm4732_vm14 = vnez %v4666_v17 }
  0xe2   :  { %vm1904_vm3 = vmpackc.low %vm416_vm4, %vm3056_vm9  ;;  %1178 = vperm.xlu2 %2204, %v2060_v24   ;;  %vm4734_vm4 = vnez %v4647_v58  ;;  %v4780_v24 = vmov 0 }
  0xe3   :  { %1905 = vmatpush.bf16.msk.msra.mxu1 %vm1904_vm3, %v2240_v11  ;;  %vm414_vm1 = vmor %vm366_vm5, %vm398_vm8  ;;  %1173 = vperm.xlu1 %2203, %v2059_v15   ;;  %vm603_vm8 = vcmp.eq.f32.partialorder %v3093_v46, %v3112_v56  ;;  %v4782_v15 = vmov 0 }
  0xe4   :  { %vm1906_vm9 = vmpackc.low %vm414_vm1, %vm413_vm0  ;;  %1168 = vperm.xlu0 %2202, %v2058_v23   ;;  %v3115_v52 = vpop.permute.xlu2 %741  ;;  %vm594_vm0 = vcmp.gt.f32.partialorder %v3036_v62, %v3112_v56  ;;  %vm591_vm1 = vcmp.gt.f32.partialorder %v2988_v45, %v3112_v56  ;;  %v2160_v45 = vld [vmem:[%s4547_s1 + $0x3d0] sm:$0xff] }
  0xe5   :  { %v556_v50 = vpop.permute.xlu1 %555  ;;  %v551_v54 = vpop.permute.xlu0 %550  ;;  %vm4733_vm2 = vmpackc.low %vm4731_vm10, %vm4732_vm14  ;;  %vm601_vm14 = vcmp.eq.f32.partialorder %v2901_v57, %v3112_v56 }
  0xe6   :  { %vm626_vm5 = vmand %vm610_vm12, %vm4734_vm4  ;;  %vm606_vm12 = vcmp.eq.f32.partialorder %v556_v50, %v3112_v56 }
  0xe7   :  { %1907 = vmatpush.bf16.msk.msra.mxu1 %vm1906_vm9, %v2240_v11  ;;  %vm3146_vm3 = vmand %vm604_vm13, %vm4720_vm11  ;;  %vm4737_vm9 = vnez %v4619_v29  ;;  %vm4740_vm13 = vnez %v4617_v28 }
  0xe8   :  { %vm623_vm10 = vmand %vm607_vm15, %vm4737_vm9  ;;  %vm4743_vm15 = vnez %v4613_v22 }
  0xe9   :  { %vm3158_vm4 = vmor %vm594_vm0, %vm626_vm5 }
  0xea   :  { %1193 = vperm.xlu2 %2204, %v2063_v55   ;;  %vm3164_vm11 = vmand %vm603_vm8, %vm4740_vm13  ;;  %vm4750_vm8 = vnez %v4629_v38  ;;  %v2165_v55 = vld [vmem:[%s4547_s1 + $0x3f8] sm:$0xff] }
  0xeb   :  { %1909 = vmatpush.bf16.msk.msra.mxu1 %vm4733_vm2, %v2240_v11  ;;  %vm605_vm2 = vcmp.eq.f32.partialorder %v551_v54, %v3112_v56  ;;  %1188 = vperm.xlu1 %2203, %v2062_v59   ;;  %vm3172_vm9 = vmand %vm606_vm12, %vm4743_vm15 }
  0xec   :  { %1183 = vperm.xlu0 %2202, %v2061_v51   ;;  %v3168_v60 = vpop.permute.xlu2 %756  ;;  %vm3176_vm0 = vmor %vm591_vm1, %vm623_vm10  ;;  %vm4753_vm10 = vnez %v4625_v33 }
  0xed   :  { %v571_v1 = vpop.permute.xlu1 %570  ;;  %v566_v2 = vpop.permute.xlu0 %565  ;;  %v4747_v3 = vsel %vm3176_vm0, 4294967295, %v4746_v3  ;;  %vm3182_vm5 = vmand %vm601_vm14, %vm4723_vm6  ;;  %vm4756_vm6 = vnez %v4611_v18  ;;  %vm588_vm14 = vcmp.gt.f32.partialorder %v2924_v0, %v3112_v56  ;;  %vm590_vm0 = vcmp.gt.f32.partialorder %v556_v50, %v3112_v56 }
  0xee   :  { %v4749_v8 = vsel %vm3182_vm5, 4294967295, %v4748_v8  ;;  %vm3188_vm13 = vmand %vm605_vm2, %vm4750_vm8  ;;  %vm593_vm12 = vcmp.gt.f32.partialorder %v571_v1, %v3112_v56  ;;  %vm609_vm15 = vcmp.eq.f32.partialorder %v571_v1, %v3112_v56  ;;  %vm608_vm1 = vcmp.eq.f32.partialorder %v566_v2, %v3112_v56 }
  0xef   :  { %vm3197_vm7 = vmand %vm608_vm1, %vm4753_vm10  ;;  %vm592_vm2 = vcmp.gt.f32.partialorder %v566_v2, %v3112_v56  ;;  %vm602_vm1 = vcmp.eq.f32.partialorder %v3095_v48, %v3112_v56  ;;  %v2069_v2 = vld [vmem:[%s4547_s1 + $0x2f8] sm:$0xff] }
  0xf0   :  { %vm625_vm8 = vmand %vm609_vm15, %vm4756_vm6  ;;  %vm4776_vm6 = vnez %v4645_v53 }
  0xf1   :  { %vm641_vm5 = vmor %vm593_vm12, %vm625_vm8  ;;  %vm4759_vm8 = vcmp.gt.f32.partialorder %v3093_v46, %v3112_v56  ;;  %v2110_v46 = vld [vmem:[%s4547_s1 + $0x340] sm:$0xff] }
  0xf2   :  { %vm1942_vm15 = vmpackc.low %vm3158_vm4, %vm641_vm5  ;;  %1208 = vperm.xlu2 %2204, %v2066_v16   ;;  %vm4762_vm4 = vnez %v4683_v7  ;;  %v2067_v16 = vld [vmem:[%s4547_s1 + $0x2e8] sm:$0xff] }
  0xf3   :  { %1943 = vmatpush.bf16.msk.msra.mxu2 %vm1942_vm15, %v2240_v11  ;;  %1203 = vperm.xlu1 %2203, %v2065_v61   ;;  %vm3226_vm10 = vmor %vm592_vm2, %vm3197_vm7 }
  0xf4   :  { %vm3235_vm12 = vmor %vm4759_vm8, %vm3164_vm11  ;;  %1198 = vperm.xlu0 %2202, %v2064_v19   ;;  %v3250_v63 = vpop.permute.xlu2 %771  ;;  %vm4765_vm11 = vcmp.gt.f32.partialorder %v551_v54, %v3112_v56  ;;  %v2161_v19 = vld [vmem:[%s4547_s1 + $0x3d8] sm:$0xff] }
  0xf5   :  { %vm3246_vm7 = vmand %vm602_vm1, %vm4762_vm4  ;;  %v722_v62 = vpop.permute.xlu1 %721  ;;  %v717_v20 = vpop.permute.xlu0 %716 }
  0xf6   :  { %v4764_v37 = vsel %vm3246_vm7, 4294967295, %v4763_v37  ;;  %vm3256_vm5 = vmor %vm4765_vm11, %vm3188_vm13  ;;  %vm585_vm13 = vcmp.gt.f32.partialorder %v2901_v57, %v3112_v56  ;;  %vm812_vm15 = vcmp.eq.f32.partialorder %v722_v62, %v3242_v30  ;;  %vm811_vm8 = vcmp.eq.f32.partialorder %v717_v20, %v3242_v30  ;;  %v2164_v57 = vld [vmem:[%s4547_s1 + $0x3f0] sm:$0xff] }
  0xf7   :  { %vm3262_vm2 = vmor %vm590_vm0, %vm3172_vm9  ;;  %vm4772_vm9 = vnez %v4747_v3  ;;  %vm4773_vm11 = vnez %v4623_v32  ;;  %v3439_v3 = vld [vmem:[%s4546_s0 + $0x4] ss:$0 sm:$0xff] }
  0xf8   :  { %vm3271_vm1 = vmor %vm588_vm14, %vm3146_vm3  ;;  %vm795_vm3 = vcmp.gt.f32.partialorder %v717_v20, %v3242_v30  ;;  %vm796_vm14 = vcmp.gt.f32.partialorder %v722_v62, %v3242_v30  ;;  %v2152_v62 = vld [vmem:[%s4547_s1 + $0x390] sm:$0xff] }
  0xf9   :  { %vm1944_vm0 = vmpackc.low %vm3226_vm10, %vm4772_vm9 }
  0xfa   :  { %vm3285_vm4 = vmand %vm812_vm15, %vm4773_vm11  ;;  %1945 = vmatpush.bf16.msk.msra.mxu2 %vm1944_vm0, %v2240_v11  ;;  %vm4777_vm15 = vnez %v4749_v8  ;;  %1650 = vperm.xlu2 %2204, %v2164_v57   ;;  %v4858_v57 = vmov 0 }
  0xfb   :  { %vm827_vm7 = vmand %vm811_vm8, %vm4776_vm6  ;;  %vm599_vm8 = vcmp.eq.f32.partialorder %v3044_v41, %v3112_v56  ;;  %1439 = vperm.xlu1 %2203, %v2117_v40  }
  0xfc   :  { %vm1946_vm10 = vmpackc.low %vm3262_vm2, %vm3256_vm5  ;;  %vm586_vm2 = vcmp.gt.f32.partialorder %v3095_v48, %v3112_v56  ;;  %1434 = vperm.xlu0 %2202, %v2116_v43   ;;  %v3328_v23 = vpop.permute.xlu2 %786  ;;  %v2115_v48 = vld [vmem:[%s4547_s1 + $0x368] sm:$0xff] }
  0xfd   :  { %vm3309_vm9 = vmor %vm585_vm13, %vm4777_vm15  ;;  %vm600_vm13 = vcmp.eq.f32.partialorder %v3042_v4, %v3112_v56  ;;  %v3338_v50 = vpop.permute.xlu1 %736  ;;  %v3340_v54 = vpop.permute.xlu0 %731  ;;  %vm595_vm15 = vcmp.eq.f32.partialorder %v2805_v31, %v3112_v56  ;;  %v2111_v43 = vld [vmem:[%s4547_s1 + $0x348] sm:$0xff] }
  0xfe   :  { %vm3315_vm0 = vmor %vm795_vm3, %vm827_vm7  ;;  %1947 = vmatpush.bf16.msk.msra.mxu2 %vm1946_vm10, %v2240_v11  ;;  %vm4784_vm3 = vnez %v4633_v42  ;;  %vm4785_vm7 = vnez %v4764_v37  ;;  %v4842_v37 = vmov 0 }
  0xff   :  { %v4781_v24 = vsel %vm3315_vm0, 4294967295, %v4780_v24  ;;  %vm3322_vm5 = vmor %vm796_vm14, %vm3285_vm4  ;;  %vm583_vm14 = vcmp.gt.f32.partialorder %v3044_v41, %v3112_v56  ;;  %vm584_vm0 = vcmp.gt.f32.partialorder %v3042_v4, %v3112_v56  ;;  %v2114_v41 = vld [vmem:[%s4547_s1 + $0x360] sm:$0xff] }
 0x100   :  { %v4783_v15 = vsel %vm3322_vm5, 4294967295, %v4782_v15  ;;  %vm615_vm4 = vmand %vm599_vm8, %vm4784_vm3  ;;  %vm4786_vm5 = vnez %v4658_v9 }
 0x101   :  { %vm1948_vm10 = vmpackc.low %vm3271_vm1, %vm3235_vm12  ;;  %vm597_vm12 = vcmp.eq.f32.partialorder %v2997_v27, %v3112_v56 }
 0x102   :  { %1949 = vmatpush.bf16.msk.msra.mxu2 %vm1948_vm10, %v2240_v11  ;;  %vm634_vm8 = vmor %vm586_vm2, %vm4785_vm7  ;;  %vm598_vm7 = vcmp.eq.f32.partialorder %v2866_v12, %v3112_v56  ;;  %1429 = vperm.xlu2 %2204, %v2115_v48   ;;  %vm4791_vm10 = vnez %v4693_v44  ;;  %v4820_v48 = vmov 0 }
 0x103   :  { %vm616_vm3 = vmand %vm600_vm13, %vm4786_vm5  ;;  %1424 = vperm.xlu1 %2203, %v2114_v41   ;;  %vm4792_vm5 = vnez %v4691_v5 }
 0x104   :  { %vm3368_vm1 = vmor %vm583_vm14, %vm615_vm4  ;;  %vm581_vm14 = vcmp.gt.f32.partialorder %v2997_v27, %v3112_v56  ;;  %1655 = vperm.xlu0 %2202, %v2165_v55   ;;  %v3387_v51 = vpop.permute.xlu2 %937  ;;  %v2068_v27 = vld [vmem:[%s4547_s1 + $0x2f0] sm:$0xff] }
 0x105   :  { %vm3374_vm2 = vmand %vm595_vm15, %vm4776_vm6  ;;  %v3393_v14 = vpop.permute.xlu1 %751  ;;  %v3395_v17 = vpop.permute.xlu0 %746 }
 0x106   :  { %vm1950_vm13 = vmpackc.low %vm634_vm8, %vm3309_vm9  ;;  %vm596_vm9 = vcmp.eq.f32.partialorder %v2999_v6, %v3112_v56 }
 0x107   :  { %1951 = vmatpush.bf16.msk.msra.mxu2 %vm1950_vm13, %v2240_v11  ;;  %vm632_vm4 = vmor %vm584_vm0, %vm616_vm3  ;;  %vm582_vm0 = vcmp.gt.f32.partialorder %v2866_v12, %v3112_v56  ;;  %v2163_v12 = vld [vmem:[%s4547_s1 + $0x3e8] sm:$0xff] }
 0x108   :  { %vm613_vm15 = vmand %vm597_vm12, %vm4791_vm10  ;;  %vm580_vm12 = vcmp.gt.f32.partialorder %v2999_v6, %v3112_v56  ;;  %vm4805_vm10 = vnez %v4625_v33 }
 0x109   :  { %vm614_vm6 = vmand %vm598_vm7, %vm4792_vm5 }
 0x10a   :  { %vm1952_vm3 = vmpackc.low %vm632_vm4, %vm3368_vm1  ;;  %vm579_vm1 = vcmp.gt.f32.partialorder %v2805_v31, %v3112_v56  ;;  %1218 = vperm.xlu2 %2204, %v2068_v27   ;;  %v2113_v31 = vld [vmem:[%s4547_s1 + $0x358] sm:$0xff]  ;;  %v2112_v56 = vld [vmem:[%s4547_s1 + $0x350] sm:$0xff] }
 0x10b   :  { %1953 = vmatpush.bf16.msk.msra.mxu2 %vm1952_vm3, %v2240_v11  ;;  %vm629_vm8 = vmor %vm581_vm14, %vm613_vm15  ;;  %1645 = vperm.xlu1 %2203, %v2163_v12   ;;  %vm1028_vm3 = vcmp.eq.f32.partialorder %v3387_v51, %v3439_v3  ;;  %v2108_v27 = vld [vmem:[%s4547_s1 + $0x330] sm:$0xff]  ;;  %v4875_v12 = vmov 0 }
 0x10c   :  { %vm612_vm7 = vmand %vm596_vm9, %vm4773_vm11  ;;  %1640 = vperm.xlu0 %2202, %v2162_v13   ;;  %v3418_v6 = vpop.permute.xlu2 %952  ;;  %vm822_vm9 = vcmp.eq.f32.partialorder %v3250_v63, %v3242_v30  ;;  %v2159_v13 = vld [vmem:[%s4547_s1 + $0x3c8] sm:$0xff] }
 0x10d   :  { %vm630_vm13 = vmor %vm582_vm0, %vm614_vm6  ;;  %v3420_v49 = vpop.permute.xlu1 %766  ;;  %v3422_v1 = vpop.permute.xlu0 %761  ;;  %vm809_vm0 = vcmp.gt.f32.partialorder %v3328_v23, %v3242_v30 }
 0x10e   :  { %vm1954_vm4 = vmpackc.low %vm630_vm13, %vm629_vm8  ;;  %vm4793_vm8 = vnez %v4611_v18 }
 0x10f   :  { %1955 = vmatpush.bf16.msk.msra.mxu2 %vm1954_vm4, %v2240_v11  ;;  %vm628_vm14 = vmor %vm580_vm12, %vm612_vm7  ;;  %vm819_vm7 = vcmp.eq.f32.partialorder %v3168_v60, %v3242_v30 }
 0x110   :  { %vm627_vm6 = vmor %vm579_vm1, %vm3374_vm2  ;;  %vm825_vm2 = vcmp.eq.f32.partialorder %v3328_v23, %v3242_v30  ;;  %vm4794_vm1 = vnez %v4613_v22 }
 0x111   :  { %vm1956_vm15 = vmpackc.low %vm628_vm14, %vm627_vm6 }
 0x112   :  { %1419 = vperm.xlu2 %2204, %v2113_v31   ;;  %vm841_vm12 = vmand %vm825_vm2, %vm4793_vm8 }
 0x113   :  { %1957 = vmatpush.bf16.msk.msra.mxu2 %vm1956_vm15, %v2240_v11  ;;  %1414 = vperm.xlu1 %2203, %v2112_v56   ;;  %vm3461_vm4 = vmand %vm822_vm9, %vm4794_vm1  ;;  %vm821_vm15 = vcmp.eq.f32.partialorder %v3420_v49, %v3242_v30  ;;  %vm4801_vm9 = vnez %v4617_v28  ;;  %v2106_v56 = vld [vmem:[%s4547_s1 + $0x320] sm:$0xff] }
 0x114   :  { %1223 = vperm.xlu0 %2202, %v2069_v2   ;;  %v3443_v8 = vpop.permute.xlu2 %967  ;;  %vm3471_vm6 = vmand %vm1028_vm3, %vm4773_vm11  ;;  %vm4804_vm11 = vnez %v4619_v29  ;;  %v2157_v2 = vld [vmem:[%s4547_s1 + $0x3b8] sm:$0xff] }
 0x115   :  { %v782_v10 = vpop.permute.xlu1 %781  ;;  %v4798_v25 = vsel %vm3471_vm6, 4294967295, %v4797_v25  ;;  %vm3480_vm2 = vmor %vm809_vm0, %vm841_vm12  ;;  %vm4806_vm12 = vnez %v4629_v38 }
 0x116   :  { %v777_v47 = vpop.permute.xlu0 %776  ;;  %vm824_vm14 = vcmp.eq.f32.partialorder %v782_v10, %v3242_v30  ;;  %vm3486_vm8 = vmand %vm819_vm7, %vm4801_vm9  ;;  %vm808_vm5 = vcmp.gt.f32.partialorder %v782_v10, %v3242_v30  ;;  %v2156_v10 = vld [vmem:[%s4547_s1 + $0x3b0] sm:$0xff] }
 0x117   :  { %vm823_vm13 = vcmp.eq.f32.partialorder %v777_v47, %v3242_v30  ;;  %vm807_vm3 = vcmp.gt.f32.partialorder %v777_v47, %v3242_v30  ;;  %vm840_vm0 = vmand %vm824_vm14, %vm4805_vm10 }
 0x118   :  { %vm839_vm1 = vmand %vm823_vm13, %vm4804_vm11  ;;  %vm806_vm13 = vcmp.gt.f32.partialorder %v3250_v63, %v3242_v30  ;;  %v2158_v63 = vld [vmem:[%s4547_s1 + $0x3c0] sm:$0xff] }
 0x119   :  { %vm3498_vm6 = vmand %vm821_vm15, %vm4806_vm12  ;;  %vm4813_vm15 = vnez %v4645_v53 }
 0x11a   :  { %1213 = vperm.xlu2 %2204, %v2067_v16   ;;  %vm3504_vm7 = vmor %vm807_vm3, %vm839_vm1  ;;  %v2154_v16 = vld [vmem:[%s4547_s1 + $0x3a0] sm:$0xff] }
 0x11b   :  { %1635 = vperm.xlu1 %2203, %v2161_v19   ;;  %vm3511_vm9 = vmor %vm808_vm5, %vm840_vm0  ;;  %vm1012_vm5 = vcmp.gt.f32.partialorder %v3387_v51, %v3439_v3  ;;  %vm4816_vm0 = vnez %v4647_v58  ;;  %v2109_v51 = vld [vmem:[%s4547_s1 + $0x338] sm:$0xff] }
 0x11c   :  { %1630 = vperm.xlu0 %2202, %v2160_v45   ;;  %v3502_v20 = vpop.permute.xlu2 %982  ;;  %vm3539_vm12 = vmor %vm806_vm13, %vm3461_vm4  ;;  %vm805_vm4 = vcmp.gt.f32.partialorder %v3420_v49, %v3242_v30 }
 0x11d   :  { %v933_v34 = vpop.permute.xlu1 %932 }
 0x11e   :  { %vm1027_vm14 = vcmp.eq.f32.partialorder %v933_v34, %v3439_v3  ;;  %v792_v0 = vpop.permute.xlu0 %791 }
 0x11f   :  { %vm3517_vm11 = vmand %vm1027_vm14, %vm4813_vm15  ;;  %vm810_vm1 = vcmp.gt.f32.partialorder %v792_v0, %v3242_v30  ;;  %vm826_vm3 = vcmp.eq.f32.partialorder %v792_v0, %v3242_v30  ;;  %vm1011_vm14 = vcmp.gt.f32.partialorder %v933_v34, %v3439_v3  ;;  %v2104_v0 = vld [vmem:[%s4547_s1 + $0x310] sm:$0xff]  ;;  %v4924_v34 = vmov 0 }
 0x120   :  { %vm842_vm10 = vmand %vm826_vm3, %vm4816_vm0  ;;  %vm803_vm3 = vcmp.gt.f32.partialorder %v3168_v60, %v3242_v30  ;;  %v4822_v60 = vmov 0 }
 0x121   :  { %vm858_vm15 = vmor %vm810_vm1, %vm842_vm10  ;;  %vm4819_vm10 = vnez %v4798_v25  ;;  %v4915_v25 = vmov 0 }
 0x122   :  { %vm1990_vm0 = vmpackc.low %vm858_vm15, %vm3480_vm2  ;;  %1620 = vperm.xlu2 %2204, %v2158_v63   ;;  %vm820_vm2 = vcmp.eq.f32.partialorder %v3422_v1, %v3242_v30 }
 0x123   :  { %1991 = vmatpush.bf16.msk.msra.mxu3 %vm1990_vm0, %v2240_v11  ;;  %1409 = vperm.xlu1 %2203, %v2111_v43   ;;  %vm3550_vm1 = vmor %vm1012_vm5, %vm4819_vm10  ;;  %vm802_vm5 = vcmp.gt.f32.partialorder %v3393_v14, %v3242_v30 }
 0x124   :  { %v4821_v48 = vsel %vm3550_vm1, 4294967295, %v4820_v48  ;;  %1404 = vperm.xlu0 %2202, %v2110_v46   ;;  %v3556_v41 = vpop.permute.xlu2 %997  ;;  %vm3560_vm13 = vmor %vm1011_vm14, %vm3517_vm11  ;;  %vm817_vm11 = vcmp.eq.f32.partialorder %v3395_v17, %v3242_v30  ;;  %vm804_vm14 = vcmp.gt.f32.partialorder %v3422_v1, %v3242_v30  ;;  %v2153_v1 = vld [vmem:[%s4547_s1 + $0x398] sm:$0xff] }
 0x125   :  { %v4823_v60 = vsel %vm3560_vm13, 4294967295, %v4822_v60  ;;  %v3566_v55 = vpop.permute.xlu1 %947  ;;  %vm3570_vm15 = vmor %vm803_vm3, %vm3486_vm8  ;;  %vm4826_vm3 = vnez %v4671_v21  ;;  %vm4830_vm13 = vnez %v4683_v7 }
 0x126   :  { %v3580_v4 = vpop.permute.xlu0 %942  ;;  %vm1992_vm0 = vmpackc.low %vm3511_vm9, %vm3504_vm7  ;;  %vm818_vm9 = vcmp.eq.f32.partialorder %v3393_v14, %v3242_v30  ;;  %vm4827_vm7 = vnez %v4676_v26  ;;  %v4888_v14 = vmov 0 }
 0x127   :  { %1993 = vmatpush.bf16.msk.msra.mxu3 %vm1992_vm0, %v2240_v11  ;;  %vm853_vm8 = vmor %vm805_vm4, %vm3498_vm6  ;;  %vm801_vm4 = vcmp.gt.f32.partialorder %v3395_v17, %v3242_v30  ;;  %vm813_vm0 = vcmp.eq.f32.partialorder %v3087_v35, %v3242_v30 }
 0x128   :  { %vm836_vm10 = vmand %vm820_vm2, %vm4826_vm3  ;;  %vm4837_vm3 = vnez %v4658_v9 }
 0x129   :  { %vm3603_vm6 = vmand %vm817_vm11, %vm4827_vm7 }
 0x12a   :  { %vm1994_vm2 = vmpackc.low %vm3539_vm12, %vm853_vm8  ;;  %1399 = vperm.xlu2 %2204, %v2109_v51   ;;  %vm815_vm12 = vcmp.eq.f32.partialorder %v3338_v50, %v3242_v30  ;;  %v4949_v51 = vmov 0 }
 0x12b   :  { %1995 = vmatpush.bf16.msk.msra.mxu3 %vm1994_vm2, %v2240_v11  ;;  %1394 = vperm.xlu1 %2203, %v2108_v27   ;;  %vm852_vm11 = vmor %vm804_vm14, %vm836_vm10  ;;  %vm4833_vm14 = vnez %v4693_v44  ;;  %v2103_v27 = vld [vmem:[%s4547_s1 + $0x308] sm:$0xff] }
 0x12c   :  { %vm834_vm1 = vmand %vm818_vm9, %vm4830_vm13  ;;  %1625 = vperm.xlu0 %2202, %v2159_v13   ;;  %v3621_v49 = vpop.permute.xlu2 %1148  ;;  %vm816_vm9 = vcmp.eq.f32.partialorder %v3115_v52, %v3242_v30  ;;  %v4961_v13 = vmov 0 }
 0x12d   :  { %v3625_v17 = vpop.permute.xlu1 %962  ;;  %vm3629_vm8 = vmor %vm801_vm4, %vm3603_vm6  ;;  %vm799_vm4 = vcmp.gt.f32.partialorder %v3338_v50, %v3242_v30 }
 0x12e   :  { %vm3635_vm10 = vmand %vm813_vm0, %vm4833_vm14  ;;  %v3641_v31 = vpop.permute.xlu0 %957  ;;  %vm4836_vm0 = vnez %v4633_v42 }
 0x12f   :  { %vm1996_vm2 = vmpackc.low %vm852_vm11, %vm3570_vm15 }
 0x130   :  { %1997 = vmatpush.bf16.msk.msra.mxu3 %vm1996_vm2, %v2240_v11  ;;  %vm850_vm6 = vmor %vm802_vm5, %vm834_vm1  ;;  %vm814_vm1 = vcmp.eq.f32.partialorder %v3340_v54, %v3242_v30  ;;  %vm800_vm5 = vcmp.gt.f32.partialorder %v3115_v52, %v3242_v30  ;;  %vm4838_vm2 = vnez %v4691_v5 }
 0x131   :  { %vm831_vm14 = vmand %vm815_vm12, %vm4836_vm0 }
 0x132   :  { %vm832_vm15 = vmand %vm816_vm9, %vm4837_vm3  ;;  %1384 = vperm.xlu2 %2204, %v2106_v56   ;;  %vm798_vm9 = vcmp.gt.f32.partialorder %v3340_v54, %v3242_v30  ;;  %v2155_v54 = vld [vmem:[%s4547_s1 + $0x3a8] sm:$0xff]  ;;  %v4891_v56 = vmov 0 }
 0x133   :  { %vm1998_vm11 = vmpackc.low %vm850_vm6, %vm3629_vm8  ;;  %1615 = vperm.xlu1 %2203, %v2157_v2   ;;  %vm797_vm8 = vcmp.gt.f32.partialorder %v3087_v35, %v3242_v30  ;;  %v2107_v35 = vld [vmem:[%s4547_s1 + $0x328] sm:$0xff]  ;;  %v3695_v30 = vld [vmem:[%s4546_s0 + $0x5] ss:$0 sm:$0xff]  ;;  %v4898_v2 = vmov 0 }
 0x134   :  { %1999 = vmatpush.bf16.msk.msra.mxu3 %vm1998_vm11, %v2240_v11  ;;  %vm847_vm12 = vmor %vm799_vm4, %vm831_vm14  ;;  %1610 = vperm.xlu0 %2202, %v2156_v10   ;;  %v3672_v50 = vpop.permute.xlu2 %1163 }
 0x135   :  { %vm830_vm3 = vmand %vm814_vm1, %vm4838_vm2  ;;  %v3674_v47 = vpop.permute.xlu1 %977  ;;  %vm1033_vm1 = vcmp.eq.f32.partialorder %v3625_v17, %v3439_v3 }
 0x136   :  { %vm848_vm0 = vmor %vm800_vm5, %vm832_vm15  ;;  %v3678_v52 = vpop.permute.xlu0 %972  ;;  %vm1040_vm15 = vcmp.eq.f32.partialorder %v3556_v41, %v3439_v3  ;;  %vm4839_vm5 = vnez %v4629_v38 }
 0x137   :  { %vm2000_vm6 = vmpackc.low %vm848_vm0, %vm847_vm12  ;;  %vm1037_vm0 = vcmp.eq.f32.partialorder %v3502_v20, %v3439_v3  ;;  %vm1243_vm12 = vcmp.eq.f32.partialorder %v3621_v49, %v3695_v30 }
 0x138   :  { %2001 = vmatpush.bf16.msk.msra.mxu3 %vm2000_vm6, %v2240_v11  ;;  %vm846_vm14 = vmor %vm798_vm9, %vm830_vm3  ;;  %vm1246_vm9 = vcmp.eq.f32.partialorder %v3672_v50, %v3695_v30  ;;  %vm4844_vm6 = vnez %v4625_v33 }
 0x139   :  { %vm845_vm4 = vmor %vm797_vm8, %vm3635_vm10  ;;  %vm1034_vm10 = vcmp.eq.f32.partialorder %v3443_v8, %v3439_v3 }
 0x13a   :  { %vm2002_vm3 = vmpackc.low %vm846_vm14, %vm845_vm4  ;;  %1605 = vperm.xlu2 %2204, %v2155_v54   ;;  %vm1036_vm4 = vcmp.eq.f32.partialorder %v3674_v47, %v3439_v3  ;;  %v4908_v54 = vmov 0 }
 0x13b   :  { %1600 = vperm.xlu1 %2203, %v2154_v16   ;;  %vm3710_vm11 = vmand %vm1037_vm0, %vm4839_vm5  ;;  %vm4848_vm0 = vnez %v4781_v24  ;;  %v4853_v24 = vmov 0  ;;  %v2151_v16 = vld [vmem:[%s4547_s1 + $0x388] sm:$0xff] }
 0x13c   :  { %2003 = vmatpush.bf16.msk.msra.mxu3 %vm2002_vm3, %v2240_v11  ;;  %1389 = vperm.xlu0 %2202, %v2107_v35   ;;  %v3704_v61 = vpop.permute.xlu2 %1178  ;;  %vm3722_vm8 = vmand %vm1034_vm10, %vm4830_vm13  ;;  %vm4847_vm3 = vnez %v4783_v15  ;;  %v2105_v15 = vld [vmem:[%s4547_s1 + $0x318] sm:$0xff]  ;;  %vm4852_vm13 = vnez %v4645_v53  ;;  %v2150_v35 = vld [vmem:[%s4547_s1 + $0x380] sm:$0xff] }
 0x13d   :  { %v993_v19 = vpop.permute.xlu1 %992  ;;  %v4843_v37 = vsel %vm3722_vm8, 4294967295, %v4842_v37  ;;  %vm3728_vm14 = vmand %vm1040_vm15, %vm4844_vm6  ;;  %vm4860_vm6 = vnez %v4619_v29 }
 0x13e   :  { %v3718_v45 = vpop.permute.xlu0 %987  ;;  %vm4849_vm5 = vmpackc.low %vm4847_vm3, %vm4848_vm0  ;;  %vm1039_vm15 = vcmp.eq.f32.partialorder %v993_v19, %v3439_v3  ;;  %vm1024_vm0 = vcmp.gt.f32.partialorder %v3556_v41, %v3439_v3 }
 0x13f   :  { %vm3745_vm10 = vmand %vm1033_vm1, %vm4827_vm7  ;;  %vm1035_vm1 = vcmp.eq.f32.partialorder %v3678_v52, %v3439_v3  ;;  %vm1023_vm7 = vcmp.gt.f32.partialorder %v993_v19, %v3439_v3  ;;  %v4913_v19 = vmov 0 }
 0x140   :  { %2005 = vmatpush.bf16.msk.msra.mxu3 %vm4849_vm5, %v2240_v11  ;;  %vm3755_vm3 = vmand %vm1243_vm12, %vm4852_vm13  ;;  %vm4857_vm12 = vnez %v4671_v21 }
 0x141   :  { %v4854_v24 = vsel %vm3755_vm3, 4294967295, %v4853_v24  ;;  %vm3761_vm5 = vmand %vm1246_vm9, %vm4838_vm2  ;;  %vm1038_vm9 = vcmp.eq.f32.partialorder %v3718_v45, %v3439_v3 }
 0x142   :  { %v4856_v39 = vsel %vm3761_vm5, 4294967295, %v4855_v39  ;;  %vm3774_vm13 = vmand %vm1036_vm4, %vm4857_vm12  ;;  %1590 = vperm.xlu2 %2204, %v2152_v62   ;;  %vm4861_vm5 = vnez %v4617_v28  ;;  %vm4864_vm12 = vnez %v4613_v22 }
 0x143   :  { %v4859_v57 = vsel %vm3774_vm13, 4294967295, %v4858_v57  ;;  %vm1055_vm2 = vmand %vm1039_vm15, %vm4860_vm6  ;;  %1379 = vperm.xlu1 %2203, %v2105_v15   ;;  %vm4877_vm6 = vnez %v4611_v18 }
 0x144   :  { %vm3787_vm8 = vmand %vm1035_vm1, %vm4861_vm5  ;;  %1374 = vperm.xlu0 %2202, %v2104_v0   ;;  %v3791_v63 = vpop.permute.xlu2 %1193 }
 0x145   :  { %vm3797_vm13 = vmand %vm1038_vm9, %vm4864_vm12  ;;  %v1008_v46 = vpop.permute.xlu1 %1007 }
 0x146   :  { %vm3803_vm15 = vmor %vm1024_vm0, %vm3728_vm14  ;;  %vm1042_vm3 = vcmp.eq.f32.partialorder %v1008_v46, %v3439_v3  ;;  %v1003_v41 = vpop.permute.xlu0 %1002  ;;  %vm4871_vm14 = vnez %v4647_v58 }
 0x147   :  { %vm3810_vm4 = vmor %vm1023_vm7, %vm1055_vm2  ;;  %vm1025_vm1 = vcmp.gt.f32.partialorder %v1003_v41, %v3439_v3  ;;  %vm1041_vm5 = vcmp.eq.f32.partialorder %v1003_v41, %v3439_v3  ;;  %vm4874_vm7 = vcmp.gt.f32.partialorder %v3502_v20, %v3439_v3  ;;  %v2102_v20 = vld [vmem:[%s4547_s1 + $0x300] sm:$0xff]  ;;  %v4947_v41 = vmov 0 }
 0x148   :  { %vm3819_vm0 = vmand %vm1042_vm3, %vm4871_vm14  ;;  %vm1031_vm3 = vcmp.eq.f32.partialorder %v3418_v6, %v3439_v3 }
 0x149   :  { %vm3833_vm2 = vmor %vm4874_vm7, %vm3710_vm11  ;;  %vm4878_vm11 = vcmp.gt.f32.partialorder %v3625_v17, %v3439_v3  ;;  %v4884_v17 = vmov 0 }
 0x14a   :  { %v4876_v12 = vsel %vm3833_vm2, 4294967295, %v4875_v12  ;;  %vm1057_vm14 = vmand %vm1041_vm5, %vm4877_vm6  ;;  %vm4881_vm6 = vcmp.gt.f32.partialorder %v1008_v46, %v3439_v3  ;;  %1369 = vperm.xlu2 %2204, %v2103_v27   ;;  %v4951_v27 = vmov 0 }
 0x14b   :  { %vm3853_vm7 = vmor %vm4878_vm11, %vm3745_vm10  ;;  %vm4882_vm10 = vnez %v4843_v37  ;;  %vm4883_vm11 = vcmp.gt.f32.partialorder %v3443_v8, %v3439_v3  ;;  %1364 = vperm.xlu1 %2203, %v2102_v20   ;;  %v4894_v8 = vmov 0  ;;  %v4918_v37 = vmov 0 }
 0x14c   :  { %vm1073_vm12 = vmor %vm1025_vm1, %vm1057_vm14  ;;  %vm4886_vm1 = vnez %v4856_v39  ;;  %vm4887_vm14 = vcmp.gt.f32.partialorder %v3672_v50, %v3695_v30  ;;  %1595 = vperm.xlu0 %2202, %v2153_v1   ;;  %v3913_v10 = vpop.permute.xlu2 %1208  ;;  %v4902_v50 = vmov 0  ;;  %v4062_v39 = vld [vmem:[%s4546_s0 + $0x7] ss:$0 sm:$0xff]  ;;  %v4958_v20 = vmov 0 }
 0x14d   :  { %vm1074_vm2 = vmor %vm4881_vm6, %vm3819_vm0  ;;  %vm4890_vm6 = vnez %v4633_v42  ;;  %v4964_v1 = vmov 0 }
 0x14e   :  { %vm3873_vm9 = vmor %vm4883_vm11, %vm4882_vm10  ;;  %vm1032_vm10 = vcmp.eq.f32.partialorder %v3641_v31, %v3439_v3 }
 0x14f   :  { %v4885_v17 = vsel %vm3873_vm9, 4294967295, %v4884_v17  ;;  %vm3882_vm5 = vmor %vm4887_vm14, %vm4886_vm1  ;;  %vm4893_vm9 = vcmp.gt.f32.partialorder %v3678_v52, %v3439_v3  ;;  %vm4896_vm14 = vnez %v4859_v57  ;;  %v1159_v52 = vpop.permute.xlu1 %1158  ;;  %v4069_v57 = vld [vmem:[%s4546_s0 + $0x6] ss:$0 sm:$0xff] }
 0x150   :  { %v4889_v14 = vsel %vm3882_vm5, 4294967295, %v4888_v14  ;;  %vm3888_vm0 = vmand %vm1031_vm3, %vm4890_vm6  ;;  %vm4897_vm3 = vcmp.gt.f32.partialorder %v3674_v47, %v3439_v3 }
 0x151   :  { %v4892_v56 = vsel %vm3888_vm0, 4294967295, %v4891_v56  ;;  %vm2038_vm11 = vmpackc.low %vm1074_vm2, %vm1073_vm12  ;;  %vm4900_vm12 = vnez %v4854_v24  ;;  %vm4904_vm2 = vcmp.gt.f32.partialorder %v3718_v45, %v3439_v3  ;;  %vm1229_vm0 = vcmp.gt.f32.partialorder %v1159_v52, %v3695_v30 }
 0x152   :  { %vm3899_vm1 = vmor %vm4893_vm9, %vm3787_vm8  ;;  %2039 = vmatpush.bf16.msk.msrb.mxu0 %vm2038_vm11, %v2240_v11  ;;  %vm4901_vm8 = vcmp.gt.f32.partialorder %v3621_v49, %v3695_v30  ;;  %vm4907_vm11 = vnez %v4658_v9  ;;  %v1154_v49 = vpop.permute.xlu0 %1153 }
 0x153   :  { %v4895_v8 = vsel %vm3899_vm1, 4294967295, %v4894_v8  ;;  %vm3908_vm6 = vmor %vm4897_vm3, %vm4896_vm14  ;;  %1585 = vperm.xlu1 %2203, %v2151_v16  }
 0x154   :  { %v4899_v2 = vsel %vm3908_vm6, 4294967295, %v4898_v2  ;;  %vm3920_vm9 = vmor %vm4901_vm8, %vm4900_vm12  ;;  %vm1245_vm12 = vcmp.eq.f32.partialorder %v1159_v52, %v3695_v30  ;;  %vm1244_vm6 = vcmp.eq.f32.partialorder %v1154_v49, %v3695_v30  ;;  %1580 = vperm.xlu0 %2202, %v2150_v35   ;;  %v1651_v45 = vpop.permute.xlu2 %1650  ;;  %v4977_v52 = vmov 0 }
 0x155   :  { %v4903_v50 = vsel %vm3920_vm9, 4294967295, %v4902_v50  ;;  %vm3929_vm14 = vmor %vm4904_vm2, %vm3797_vm13  ;;  %vm4910_vm13 = vnez %v4693_v44  ;;  %v4997_v35 = vmov 0 }
 0x156   :  { %vm3935_vm3 = vmand %vm1032_vm10, %vm4907_vm11  ;;  %vm1029_vm10 = vcmp.eq.f32.partialorder %v3580_v4, %v3439_v3 }
 0x157   :  { %v4909_v54 = vsel %vm3935_vm3, 4294967295, %v4908_v54  ;;  %vm2040_vm8 = vmpackc.low %vm3803_vm15, %vm3810_vm4  ;;  %vm4911_vm3 = vnez %v4876_v12  ;;  %vm1228_vm4 = vcmp.gt.f32.partialorder %v1154_v49, %v3695_v30  ;;  %vm4912_vm15 = vnez %v4623_v32  ;;  %v1174_v36 = vpop.permute.xlu1 %1173 }
 0x158   :  { %vm1261_vm2 = vmand %vm1245_vm12, %vm4910_vm13  ;;  %2041 = vmatpush.bf16.msk.msrb.mxu0 %vm2040_vm8, %v2240_v11  ;;  %vm1016_vm8 = vcmp.gt.f32.partialorder %v3641_v31, %v3439_v3  ;;  %vm1232_vm5 = vcmp.gt.f32.partialorder %v1174_v36, %v3695_v30  ;;  %v4931_v31 = vmov 0  ;;  %v4980_v49 = vmov 0 }
 0x159   :  { %vm2042_vm11 = vmpackc.low %vm3929_vm14, %vm4911_vm3  ;;  %vm1248_vm14 = vcmp.eq.f32.partialorder %v1174_v36, %v3695_v30 }
 0x15a   :  { %vm1260_vm12 = vmand %vm1244_vm6, %vm4912_vm15  ;;  %vm4917_vm6 = vnez %v4885_v17  ;;  %v1169_v62 = vpop.permute.xlu0 %1168  ;;  %vm4923_vm15 = vcmp.gt.f32.partialorder %v3418_v6, %v3439_v3  ;;  %v4929_v6 = vmov 0  ;;  %v4967_v17 = vmov 0 }
 0x15b   :  { %vm3964_vm1 = vmor %vm1229_vm0, %vm1261_vm2  ;;  %vm4921_vm0 = vnez %v4899_v2  ;;  %v4974_v2 = vmov 0 }
 0x15c   :  { %v4914_v19 = vsel %vm3964_vm1, 4294967295, %v4913_v19  ;;  %vm3972_vm3 = vmand %vm1029_vm10, %vm4910_vm13  ;;  %2043 = vmatpush.bf16.msk.msrb.mxu0 %vm2042_vm11, %v2240_v11  ;;  %vm4920_vm11 = vnez %v4895_v8  ;;  %vm4926_vm10 = vnez %v4658_v9  ;;  %vm1247_vm1 = vcmp.eq.f32.partialorder %v1169_v62, %v3695_v30  ;;  %v1430_v15 = vpop.permute.xlu2 %1429 }
 0x15d   :  { %v4916_v25 = vsel %vm3972_vm3, 4294967295, %v4915_v25  ;;  %vm3985_vm2 = vmor %vm1228_vm4, %vm1260_vm12  ;;  %vm4922_vm12 = vnez %v4892_v56  ;;  %vm4928_vm3 = vnez %v4909_v54  ;;  %v4971_v56 = vmov 0 }
 0x15e   :  { %v4919_v37 = vsel %vm3985_vm2, 4294967295, %v4918_v37  ;;  %vm2044_vm4 = vmpackc.low %vm4921_vm0, %vm4920_vm11  ;;  %vm1231_vm2 = vcmp.gt.f32.partialorder %v1169_v62, %v3695_v30  ;;  %vm4927_vm0 = vnez %v4633_v42  ;;  %v5006_v62 = vmov 0 }
 0x15f   :  { %vm4005_vm13 = vmor %vm4923_vm15, %vm4922_vm12  ;;  %vm1030_vm12 = vcmp.eq.f32.partialorder %v3566_v55, %v3439_v3 }
 0x160   :  { %v4925_v34 = vsel %vm4005_vm13, 4294967295, %v4924_v34  ;;  %vm1264_vm9 = vmand %vm1248_vm14, %vm4926_vm10  ;;  %2045 = vmatpush.bf16.msk.msrb.mxu0 %vm2044_vm4, %v2240_v11  ;;  %vm1013_vm14 = vcmp.gt.f32.partialorder %v3580_v4, %v3439_v3  ;;  %v4045_v4 = vpop.permute.xlu1 %1188 }
 0x161   :  { %vm1263_vm11 = vmand %vm1247_vm1, %vm4927_vm0  ;;  %vm1456_vm0 = vcmp.gt.f32.partialorder %v1430_v15, %v4069_v57 }
 0x162   :  { %vm1064_vm15 = vmor %vm1016_vm8, %vm4928_vm3  ;;  %vm1014_vm8 = vcmp.gt.f32.partialorder %v3566_v55, %v3439_v3  ;;  %v4047_v24 = vpop.permute.xlu0 %1183 }
 0x163   :  { %vm4021_vm13 = vmor %vm1231_vm2, %vm1263_vm11  ;;  %vm4935_vm2 = vnez %v4916_v25  ;;  %v5000_v25 = vmov 0 }
 0x164   :  { %v4930_v6 = vsel %vm4021_vm13, 4294967295, %v4929_v6  ;;  %vm4027_vm10 = vmor %vm1232_vm5, %vm1264_vm9  ;;  %vm4934_vm5 = vnez %v4691_v5  ;;  %v4055_v3 = vpop.permute.xlu2 %1218 }
 0x165   :  { %v4932_v31 = vsel %vm4027_vm10, 4294967295, %v4931_v31  ;;  %vm4933_vm1 = vmpackc.low %vm4917_vm6, %vm3853_vm7  ;;  %vm4936_vm6 = vnez %v4925_v34  ;;  %vm1257_vm10 = vcmp.eq.f32.partialorder %v4055_v3, %v3695_v30 }
 0x166   :  { %2047 = vmatpush.bf16.msk.msrb.mxu0 %vm4933_vm1, %v2240_v11  ;;  %vm1046_vm9 = vmand %vm1030_vm12, %vm4934_vm5  ;;  %vm4938_vm12 = vnez %v4823_v60 }
 0x167   :  { %vm1061_vm7 = vmor %vm1013_vm14, %vm4935_vm2  ;;  %vm4940_vm2 = vnez %v4611_v18  ;;  %v4954_v18 = vmov 0 }
 0x168   :  { %vm2048_vm4 = vmpackc.low %vm1064_vm15, %vm4936_vm6  ;;  %v4057_v55 = vpop.permute.xlu1 %1203  ;;  %vm4937_vm15 = vnez %v4821_v48  ;;  %vm4943_vm6 = vnez %v4625_v33 }
 0x169   :  { %vm1062_vm11 = vmor %vm1014_vm8, %vm1046_vm9  ;;  %vm1689_vm8 = vcmp.eq.f32.partialorder %v1651_v45, %v4062_v39  ;;  %vm1472_vm9 = vcmp.eq.f32.partialorder %v1430_v15, %v4069_v57  ;;  %v5011_v15 = vmov 0 }
 0x16a   :  { %2049 = vmatpush.bf16.msk.msrb.mxu0 %vm2048_vm4, %v2240_v11  ;;  %vm2050_vm1 = vmpackc.low %vm1062_vm11, %vm1061_vm7  ;;  %v4064_v0 = vpop.permute.xlu0 %1198 }
 0x16b   :  { %vm4939_vm14 = vmpackc.low %vm4937_vm15, %vm4938_vm12  ;;  %vm4946_vm15 = vnez %v4647_v58 }
 0x16c   :  { %v4079_v40 = vpop.permute.xlu2 %1419  ;;  %vm4083_vm7 = vmand %vm1689_vm8, %vm4940_vm2 }
 0x16d   :  { %vm4089_vm4 = vmand %vm1472_vm9, %vm4943_vm6  ;;  %vm1673_vm9 = vcmp.gt.f32.partialorder %v1651_v45, %v4062_v39  ;;  %v5003_v45 = vmov 0 }
 0x16e   :  { %2051 = vmatpush.bf16.msk.msrb.mxu0 %vm2050_vm1, %v2240_v11 }
 0x170   :  { %v1440_v46 = vpop.permute.xlu1 %1439 }
 0x171   :  { %vm1474_vm11 = vcmp.eq.f32.partialorder %v1440_v46, %v4069_v57  ;;  %vm1458_vm1 = vcmp.gt.f32.partialorder %v1440_v46, %v4069_v57 }
 0x172   :  { %2053 = vmatpush.bf16.msk.msrb.mxu0 %vm4939_vm14, %v2240_v11  ;;  %v1435_v60 = vpop.permute.xlu0 %1434  ;;  %vm1490_vm12 = vmand %vm1474_vm11, %vm4946_vm15  ;;  %vm1253_vm11 = vcmp.eq.f32.partialorder %v4064_v0, %v3695_v30 }
 0x173   :  { %vm1457_vm14 = vcmp.gt.f32.partialorder %v1435_v60, %v4069_v57  ;;  %vm1473_vm8 = vcmp.eq.f32.partialorder %v1435_v60, %v4069_v57  ;;  %vm1506_vm13 = vmor %vm1458_vm1, %vm1490_vm12  ;;  %vm4953_vm12 = vnez %v4629_v38 }
 0x174   :  { %vm1489_vm3 = vmand %vm1473_vm8, %vm4940_vm2  ;;  %v4108_v23 = vpop.permute.xlu2 %1213 }
 0x175   :  { %vm1505_vm5 = vmor %vm1457_vm14, %vm1489_vm3  ;;  %vm1251_vm3 = vcmp.eq.f32.partialorder %v4045_v4, %v3695_v30 }
 0x176   :  { %vm2134_vm6 = vmpackc.low %vm1506_vm13, %vm1505_vm5 }
 0x177   :  { %2135 = vmatpush.bf16.msk.msrb.mxu2 %vm2134_vm6, %v2240_v11  ;;  %vm4112_vm8 = vmor %vm1673_vm9, %vm4083_vm7  ;;  %vm1254_vm7 = vcmp.eq.f32.partialorder %v4057_v55, %v3695_v30 }
 0x178   :  { %v4948_v41 = vsel %vm4112_vm8, 4294967295, %v4947_v41  ;;  %v1425_v59 = vpop.permute.xlu1 %1424  ;;  %vm4120_vm13 = vmor %vm1456_vm0, %vm4089_vm4  ;;  %vm1252_vm0 = vcmp.eq.f32.partialorder %v3791_v63, %v3695_v30  ;;  %vm1255_vm4 = vcmp.eq.f32.partialorder %v3913_v10, %v3695_v30 }
 0x179   :  { %v4950_v51 = vsel %vm4120_vm13, 4294967295, %v4949_v51  ;;  %vm4126_vm5 = vmand %vm1257_vm10, %vm4940_vm2  ;;  %vm1455_vm6 = vcmp.gt.f32.partialorder %v1425_v59, %v4069_v57  ;;  %vm1471_vm1 = vcmp.eq.f32.partialorder %v1425_v59, %v4069_v57  ;;  %vm4956_vm2 = vnez %v4619_v29 }
 0x17a   :  { %v4952_v27 = vsel %vm4126_vm5, 4294967295, %v4951_v27  ;;  %v1656_v12 = vpop.permute.xlu0 %1655  ;;  %vm4140_vm10 = vmand %vm1253_vm11, %vm4953_vm12  ;;  %vm4957_vm5 = vnez %v4617_v28  ;;  %vm4960_vm12 = vnez %v4613_v22 }
 0x17b   :  { %v4955_v18 = vsel %vm4140_vm10, 4294967295, %v4954_v18  ;;  %vm1487_vm14 = vmand %vm1471_vm1, %vm4956_vm2  ;;  %vm1690_vm9 = vcmp.eq.f32.partialorder %v1656_v12, %v4062_v39  ;;  %vm1674_vm13 = vcmp.gt.f32.partialorder %v1656_v12, %v4062_v39  ;;  %vm4963_vm2 = vnez %v4671_v21 }
 0x17c   :  { %vm4149_vm8 = vmand %vm1251_vm3, %vm4957_vm5  ;;  %vm4966_vm5 = vnez %v4619_v29  ;;  %v4208_v47 = vpop.permute.xlu2 %1620  ;;  %v4988_v29 = vmov 0 }
 0x17d   :  { %v4959_v20 = vsel %vm4149_vm8, 4294967295, %v4958_v20  ;;  %vm1706_vm11 = vmand %vm1690_vm9, %vm4946_vm15  ;;  %vm1470_vm9 = vcmp.eq.f32.partialorder %v4079_v40, %v4069_v57 }
 0x17e   :  { %vm4158_vm10 = vmand %vm1254_vm7, %vm4960_vm12  ;;  %vm4969_vm7 = vnez %v4950_v51 }
 0x17f   :  { %v4962_v13 = vsel %vm4158_vm10, 4294967295, %v4961_v13  ;;  %vm1503_vm1 = vmor %vm1455_vm6, %vm1487_vm14  ;;  %vm1250_vm6 = vcmp.eq.f32.partialorder %v4047_v24, %v3695_v30 }
 0x180   :  { %vm4164_vm3 = vmand %vm1252_vm0, %vm4963_vm2  ;;  %vm1256_vm0 = vcmp.eq.f32.partialorder %v4108_v23, %v3695_v30  ;;  %v1646_v8 = vpop.permute.xlu1 %1645 }
 0x181   :  { %v4965_v1 = vsel %vm4164_vm3, 4294967295, %v4964_v1  ;;  %vm4170_vm8 = vmand %vm1255_vm4, %vm4966_vm5  ;;  %vm4970_vm4 = vnez %v4948_v41  ;;  %vm1249_vm3 = vcmp.eq.f32.partialorder %v3704_v61, %v3695_v30 }
 0x182   :  { %v4968_v17 = vsel %vm4170_vm8, 4294967295, %v4967_v17  ;;  %vm2136_vm15 = vmpackc.low %vm4969_vm7, %vm1503_vm1  ;;  %vm4973_vm1 = vnez %v4683_v7  ;;  %v1641_v54 = vpop.permute.xlu0 %1640 }
 0x183   :  { %2137 = vmatpush.bf16.msk.msrb.mxu2 %vm2136_vm15, %v2240_v11  ;;  %vm1722_vm14 = vmor %vm1674_vm13, %vm1706_vm11  ;;  %vm4976_vm13 = vnez %v4625_v33  ;;  %vm4979_vm15 = vnez %v4676_v26  ;;  %v4984_v33 = vmov 0 }
 0x184   :  { %vm2182_vm2 = vmpackc.low %vm1722_vm14, %vm4970_vm4  ;;  %vm1671_vm4 = vcmp.gt.f32.partialorder %v1641_v54, %v4062_v39  ;;  %v1400_v34 = vpop.permute.xlu2 %1399 }
 0x185   :  { %vm4189_vm8 = vmand %vm1470_vm9, %vm4960_vm12  ;;  %2183 = vmatpush.bf16.msk.msrb.mxu3 %vm2182_vm2, %v2240_v11  ;;  %vm1688_vm2 = vcmp.eq.f32.partialorder %v1646_v8, %v4062_v39  ;;  %vm1235_vm9 = vcmp.gt.f32.partialorder %v4045_v4, %v3695_v30  ;;  %v2241_v4 = vmov 1065369472  }
 0x186   :  { %v4972_v56 = vsel %vm4189_vm8, 4294967295, %v4971_v56  ;;  %vm4196_vm7 = vmand %vm1250_vm6, %vm4973_vm1  ;;  %vm1672_vm6 = vcmp.gt.f32.partialorder %v1646_v8, %v4062_v39  ;;  %259 = vmatmul.bf16.vlgmr.msra.gmra.mxu0 %v2241_v4  ;;  %475 = vmatmul.bf16.vlgmr.msra.gmra.mxu1 %v2241_v4 }
 0x187   :  { %v4975_v2 = vsel %vm4196_vm7, 4294967295, %v4974_v2  ;;  %vm4204_vm11 = vmand %vm1256_vm0, %vm4976_vm13  ;;  %vm1687_vm0 = vcmp.eq.f32.partialorder %v1641_v54, %v4062_v39  ;;  %vm4982_vm7 = vnez %v4952_v27  ;;  %691 = vmatmul.bf16.vlgmr.msra.gmra.mxu2 %v2241_v4  ;;  %907 = vmatmul.bf16.vlgmr.msra.gmra.mxu3 %v2241_v4 }
 0x188   :  { %v4978_v52 = vsel %vm4204_vm11, 4294967295, %v4977_v52  ;;  %vm1704_vm14 = vmand %vm1688_vm2, %vm4976_vm13  ;;  %vm1238_vm13 = vcmp.gt.f32.partialorder %v4057_v55, %v3695_v30  ;;  %vm4983_vm11 = vcmp.gt.f32.partialorder %v4055_v3, %v3695_v30  ;;  %v1415_v16 = vpop.permute.xlu1 %1414  ;;  %v5033_v3 = vmov 0 }
 0x189   :  { %vm4223_vm1 = vmand %vm1249_vm3, %vm4979_vm15  ;;  %vm1236_vm3 = vcmp.gt.f32.partialorder %v3791_v63, %v3695_v30  ;;  %vm1239_vm15 = vcmp.gt.f32.partialorder %v3913_v10, %v3695_v30  ;;  %v4991_v63 = vmov 0  ;;  %v4994_v10 = vmov 0 }
 0x18a   :  { %v4981_v49 = vsel %vm4223_vm1, 4294967295, %v4980_v49  ;;  %vm1703_vm12 = vmand %vm1687_vm0, %vm4966_vm5  ;;  %vm1454_vm5 = vcmp.gt.f32.partialorder %v4079_v40, %v4069_v57  ;;  %v1224_v36 = vpop.permute.xlu0 %1223  ;;  %v5040_v40 = vmov 0 }
 0x18b   :  { %vm1719_vm2 = vmor %vm1671_vm4, %vm1703_vm12  ;;  %vm4986_vm12 = vnez %v4955_v18  ;;  %vm4987_vm4 = vcmp.gt.f32.partialorder %v4064_v0, %v3695_v30 }
 0x18c   :  { %vm4238_vm8 = vmor %vm4983_vm11, %vm4982_vm7  ;;  %vm1240_vm7 = vcmp.gt.f32.partialorder %v4108_v23, %v3695_v30 }
 0x18d   :  { %v4985_v33 = vsel %vm4238_vm8, 4294967295, %v4984_v33  ;;  %vm1720_vm0 = vmor %vm1672_vm6, %vm1704_vm14  ;;  %vm4990_vm8 = vnez %v4959_v20  ;;  %vm4993_vm6 = vnez %v4962_v13 }
 0x18e   :  { %vm4253_vm1 = vmor %vm4987_vm4, %vm4986_vm12  ;;  %vm4996_vm12 = vnez %v4972_v56 }
 0x18f   :  { %v4989_v29 = vsel %vm4253_vm1, 4294967295, %v4988_v29  ;;  %vm2184_vm11 = vmpackc.low %vm1720_vm0, %vm1719_vm2  ;;  %vm5002_vm2 = vnez %v4965_v1  ;;  %vm5014_vm1 = vnez %v4981_v49 }
 0x190   :  { %vm4261_vm10 = vmor %vm1235_vm9, %vm4990_vm8  ;;  %2185 = vmatpush.bf16.msk.msrb.mxu3 %vm2184_vm11, %v2240_v11  ;;  %vm4999_vm8 = vnez %v4968_v17  ;;  %vm5005_vm11 = vnez %v4978_v52 }
 0x191   :  { %v4992_v63 = vsel %vm4261_vm10, 4294967295, %v4991_v63  ;;  %vm4268_vm14 = vmor %vm1238_vm13, %vm4993_vm6  ;;  %vm1234_vm13 = vcmp.gt.f32.partialorder %v4047_v24, %v3695_v30  ;;  %vm5009_vm10 = vnez %v4647_v58  ;;  %v1636_v58 = vpop.permute.xlu1 %1635 }
 0x192   :  { %v4995_v10 = vsel %vm4268_vm14, 4294967295, %v4994_v10  ;;  %vm4274_vm4 = vmor %vm1454_vm5, %vm4996_vm12  ;;  %vm1469_vm5 = vcmp.eq.f32.partialorder %v1415_v16, %v4069_v57 }
 0x193   :  { %v4998_v35 = vsel %vm4274_vm4, 4294967295, %v4997_v35  ;;  %vm4280_vm9 = vmor %vm1239_vm15, %vm4999_vm8  ;;  %vm5008_vm15 = vnez %v4629_v38  ;;  %vm1258_vm8 = vcmp.eq.f32.partialorder %v1224_v36, %v3695_v30 }
 0x194   :  { %v5001_v25 = vsel %vm4280_vm9, 4294967295, %v5000_v25  ;;  %vm4286_vm0 = vmor %vm1236_vm3, %vm5002_vm2  ;;  %vm1242_vm3 = vcmp.gt.f32.partialorder %v1224_v36, %v3695_v30  ;;  %vm1233_vm2 = vcmp.gt.f32.partialorder %v3704_v61, %v3695_v30  ;;  %v5015_v30 = vmov 0  ;;  %v1631_v61 = vpop.permute.xlu0 %1630 }
 0x195   :  { %v5004_v45 = vsel %vm4286_vm0, 4294967295, %v5003_v45  ;;  %vm4295_vm6 = vmor %vm1240_vm7, %vm5005_vm11  ;;  %vm1453_vm0 = vcmp.gt.f32.partialorder %v1415_v16, %v4069_v57  ;;  %vm5010_vm11 = vnez %v4975_v2 }
 0x196   :  { %v5007_v62 = vsel %vm4295_vm6, 4294967295, %v5006_v62  ;;  %vm1485_vm12 = vmand %vm1469_vm5, %vm5008_vm15  ;;  %vm5013_vm5 = vnez %v4985_v33  ;;  %1123 = vmatmul.bf16.vlgmr.msrb.gmra.mxu0 %v2241_v4 }
 0x197   :  { %vm1274_vm9 = vmand %vm1258_vm8, %vm5009_vm10  ;;  %vm5017_vm10 = vnez %v4998_v35  ;;  %vm1685_vm8 = vcmp.eq.f32.partialorder %v1631_v61, %v4062_v39 }
 0x198   :  { %vm1290_vm7 = vmor %vm1242_vm3, %vm1274_vm9  ;;  %vm5019_vm3 = vnez %v4995_v10 }
 0x199   :  { %vm4310_vm6 = vmor %vm1234_vm13, %vm5010_vm11  ;;  %vm5018_vm13 = vnez %v4989_v29  ;;  %vm1670_vm11 = vcmp.gt.f32.partialorder %v1636_v58, %v4062_v39  ;;  %v1410_v24 = vpop.permute.xlu1 %1409 }
 0x19a   :  { %v5012_v15 = vsel %vm4310_vm6, 4294967295, %v5011_v15  ;;  %vm2086_vm15 = vmpackc.low %vm1290_vm7, %vm5013_vm5  ;;  %vm5024_vm5 = vnez %v4613_v22  ;;  %vm5025_vm6 = vnez %v4629_v38  ;;  %v4351_v22 = vpop.permute.xlu2 %1384  ;;  %v5030_v38 = vmov 0 }
 0x19b   :  { %2087 = vmatpush.bf16.msk.msrb.mxu1 %vm2086_vm15, %v2240_v11  ;;  %vm1501_vm14 = vmor %vm1453_vm0, %vm1485_vm12  ;;  %vm1686_vm15 = vcmp.eq.f32.partialorder %v1636_v58, %v4062_v39  ;;  %vm5020_vm0 = vnez %v5001_v25  ;;  %vm5032_vm7 = vnez %v4683_v7  ;;  %v13_v25 = vld [vmem:[%s4546_s0] sm:$0xff] }
 0x19c   :  { %vm4319_vm4 = vmor %vm1233_vm2, %vm5014_vm1  ;;  %vm5021_vm1 = vnez %v5007_v62  ;;  %v1405_v55 = vpop.permute.xlu0 %1404 }
 0x19d   :  { %v5016_v30 = vsel %vm4319_vm4, 4294967295, %v5015_v30  ;;  %vm2138_vm9 = vmpackc.low %vm5017_vm10, %vm1501_vm14  ;;  %vm5023_vm14 = vnez %v5004_v45 }
 0x19e   :  { %2139 = vmatpush.bf16.msk.msrb.mxu2 %vm2138_vm9, %v2240_v11  ;;  %vm2088_vm12 = vmpackc.low %vm5021_vm1, %vm5020_vm0  ;;  %vm1669_vm9 = vcmp.gt.f32.partialorder %v1631_v61, %v4062_v39  ;;  %vm1683_vm1 = vcmp.eq.f32.partialorder %v4208_v47, %v4062_v39 }
 0x19f   :  { %vm1702_vm10 = vmand %vm1686_vm15, %vm5024_vm5  ;;  %2089 = vmatpush.bf16.msk.msrb.mxu1 %vm2088_vm12, %v2240_v11  ;;  %vm1466_vm12 = vcmp.eq.f32.partialorder %v1400_v34, %v4069_v57 }
 0x1a0   :  { %vm1701_vm4 = vmand %vm1685_vm8, %vm5025_vm6  ;;  %vm5027_vm8 = vnez %v5016_v30 }
 0x1a1   :  { %vm1717_vm0 = vmor %vm1669_vm9, %vm1701_vm4 }
 0x1a2   :  { %vm1718_vm15 = vmor %vm1670_vm11, %vm1702_vm10  ;;  %vm5028_vm11 = vnez %v5012_v15  ;;  %vm5029_vm10 = vnez %v4617_v28  ;;  %v1606_v0 = vpop.permute.xlu2 %1605  ;;  %v1395_v28 = vpop.permute.xlu1 %1394 }
 0x1a3   :  { %vm5026_vm4 = vmpackc.low %vm5019_vm3, %vm5018_vm13  ;;  %vm1468_vm13 = vcmp.eq.f32.partialorder %v1410_v24, %v4069_v57  ;;  %vm1452_vm3 = vcmp.gt.f32.partialorder %v1410_v24, %v4069_v57 }
 0x1a4   :  { %2091 = vmatpush.bf16.msk.msrb.mxu1 %vm5026_vm4, %v2240_v11  ;;  %vm2186_vm6 = vmpackc.low %vm1718_vm15, %vm1717_vm0  ;;  %vm5035_vm0 = vnez %v4671_v21  ;;  %vm1467_vm4 = vcmp.eq.f32.partialorder %v1405_v55, %v4069_v57  ;;  %v1626_v43 = vpop.permute.xlu0 %1625 }
 0x1a5   :  { %2187 = vmatpush.bf16.msk.msrb.mxu3 %vm2186_vm6, %v2240_v11  ;;  %vm4369_vm9 = vmand %vm1683_vm1, %vm5029_vm10  ;;  %vm1451_vm1 = vcmp.gt.f32.partialorder %v1405_v55, %v4069_v57 }
 0x1a6   :  { %v5031_v38 = vsel %vm4369_vm9, 4294967295, %v5030_v38  ;;  %vm4375_vm2 = vmand %vm1466_vm12, %vm5032_vm7  ;;  %vm5036_vm12 = vnez %v4992_v63 }
 0x1a7   :  { %v5034_v3 = vsel %vm4375_vm2, 4294967295, %v5033_v3  ;;  %vm1484_vm15 = vmand %vm1468_vm13, %vm5035_vm0  ;;  %vm1667_vm2 = vcmp.gt.f32.partialorder %v4208_v47, %v4062_v39  ;;  %vm1450_vm13 = vcmp.gt.f32.partialorder %v1400_v34, %v4069_v57 }
 0x1a8   :  { %vm5037_vm6 = vmpackc.low %vm5023_vm14, %vm5036_vm12  ;;  %vm5039_vm14 = vnez %v5031_v38 }
 0x1a9   :  { %2093 = vmatpush.bf16.msk.msrb.mxu1 %vm5037_vm6, %v2240_v11  ;;  %vm1483_vm5 = vmand %vm1467_vm4, %vm5029_vm10  ;;  %vm1449_vm10 = vcmp.gt.f32.partialorder %v1395_v28, %v4069_v57  ;;  %vm1668_vm4 = vcmp.gt.f32.partialorder %v1626_v43, %v4062_v39  ;;  %vm5047_vm6 = vnez %v4671_v21 }
 0x1aa   :  { %vm1499_vm7 = vmor %vm1451_vm1, %vm1483_vm5  ;;  %v1616_v21 = vpop.permute.xlu1 %1615 }
 0x1ab   :  { %vm1500_vm9 = vmor %vm1452_vm3, %vm1484_vm15  ;;  %vm1465_vm3 = vcmp.eq.f32.partialorder %v1395_v28, %v4069_v57  ;;  %vm5042_vm15 = vnez %v5034_v3 }
 0x1ac   :  { %vm5038_vm0 = vmpackc.low %vm5028_vm11, %vm5027_vm8 }
 0x1ad   :  { %2095 = vmatpush.bf16.msk.msrb.mxu1 %vm5038_vm0, %v2240_v11  ;;  %vm2140_vm12 = vmpackc.low %vm1500_vm9, %vm1499_vm7  ;;  %vm5043_vm7 = vnez %v4676_v26  ;;  %vm1684_vm9 = vcmp.eq.f32.partialorder %v1626_v43, %v4062_v39  ;;  %vm5044_vm0 = vnez %v4932_v31  ;;  %v5056_v31 = vmov 0 }
 0x1ae   :  { %2141 = vmatpush.bf16.msk.msrb.mxu2 %vm2140_vm12, %v2240_v11  ;;  %vm4405_vm5 = vmor %vm1667_vm2, %vm5039_vm14  ;;  %vm5045_vm2 = vnez %v4930_v6  ;;  %v5053_v6 = vmov 0 }
 0x1af   :  { %v5041_v40 = vsel %vm4405_vm5, 4294967295, %v5040_v40  ;;  %vm1498_vm8 = vmor %vm1450_vm13, %vm5042_vm15  ;;  %vm5048_vm15 = vnez %v4889_v14  ;;  %v1591_v14 = vpop.permute.xlu2 %1590 }
 0x1b0   :  { %vm1481_vm11 = vmand %vm1465_vm3, %vm5043_vm7  ;;  %vm1463_vm3 = vcmp.eq.f32.partialorder %v4351_v22, %v4069_v57  ;;  %vm5049_vm7 = vnez %v4914_v19  ;;  %v1611_v19 = vpop.permute.xlu0 %1610 }
 0x1b1   :  { %vm5046_vm1 = vmpackc.low %vm5044_vm0, %vm5045_vm2  ;;  %vm1680_vm2 = vcmp.eq.f32.partialorder %v1606_v0, %v4062_v39 }
 0x1b2   :  { %2097 = vmatpush.bf16.msk.msrb.mxu1 %vm5046_vm1, %v2240_v11  ;;  %vm1700_vm12 = vmand %vm1684_vm9, %vm5047_vm6  ;;  %vm1681_vm6 = vcmp.eq.f32.partialorder %v1611_v19, %v4062_v39 }
 0x1b3   :  { %vm1497_vm14 = vmor %vm1449_vm10, %vm1481_vm11  ;;  %vm5051_vm10 = vnez %v5041_v40 }
 0x1b4   :  { %vm2142_vm13 = vmpackc.low %vm1498_vm8, %vm1497_vm14  ;;  %vm5052_vm8 = vnez %v4633_v42  ;;  %vm5059_vm14 = vnez %v4903_v50  ;;  %v1601_v50 = vpop.permute.xlu1 %1600 }
 0x1b5   :  { %vm5050_vm5 = vmpackc.low %vm5048_vm15, %vm5049_vm7  ;;  %2143 = vmatpush.bf16.msk.msrb.mxu2 %vm2142_vm13, %v2240_v11  ;;  %vm5055_vm7 = vnez %v4658_v9  ;;  %vm5061_vm15 = vnez %v4683_v7 }
 0x1b6   :  { %2099 = vmatpush.bf16.msk.msrb.mxu1 %vm5050_vm5, %v2240_v11  ;;  %vm1716_vm0 = vmor %vm1668_vm4, %vm1700_vm12  ;;  %vm1682_vm5 = vcmp.eq.f32.partialorder %v1616_v21, %v4062_v39  ;;  %vm1665_vm4 = vcmp.gt.f32.partialorder %v1611_v19, %v4062_v39  ;;  %vm5058_vm12 = vnez %v4919_v37 }
 0x1b7   :  { %vm2188_vm11 = vmpackc.low %vm1716_vm0, %vm5051_vm10  ;;  %v1370_v37 = vpop.permute.xlu2 %1369 }
 0x1b8   :  { %2189 = vmatpush.bf16.msk.msrb.mxu3 %vm2188_vm11, %v2240_v11  ;;  %vm4441_vm9 = vmand %vm1463_vm3, %vm5052_vm8  ;;  %vm1666_vm3 = vcmp.gt.f32.partialorder %v1616_v21, %v4062_v39  ;;  %vm1447_vm11 = vcmp.gt.f32.partialorder %v4351_v22, %v4069_v57  ;;  %vm1664_vm8 = vcmp.gt.f32.partialorder %v1606_v0, %v4062_v39 }
 0x1b9   :  { %v5054_v6 = vsel %vm4441_vm9, 4294967295, %v5053_v6  ;;  %vm4448_vm1 = vmand %vm1680_vm2, %vm5055_vm7  ;;  %vm5062_vm2 = vnez %v4676_v26  ;;  %v1390_v26 = vpop.permute.xlu0 %1389 }
 0x1ba   :  { %v5057_v31 = vsel %vm4448_vm1, 4294967295, %v5056_v31  ;;  %vm5060_vm13 = vmpackc.low %vm5058_vm12, %vm5059_vm14  ;;  %vm5063_vm12 = vnez %v5054_v6 }
 0x1bb   :  { %2101 = vmatpush.bf16.msk.msrb.mxu1 %vm5060_vm13, %v2240_v11  ;;  %vm1698_vm0 = vmand %vm1682_vm5, %vm5061_vm15  ;;  %vm1679_vm5 = vcmp.eq.f32.partialorder %v1601_v50, %v4062_v39 }
 0x1bc   :  { %vm1697_vm10 = vmand %vm1681_vm6, %vm5062_vm2  ;;  %vm5064_vm6 = vnez %v5057_v31 }
 0x1bd   :  { %vm1713_vm7 = vmor %vm1665_vm4, %vm1697_vm10  ;;  %vm5067_vm4 = vnez %v4633_v42  ;;  %vm1677_vm10 = vcmp.eq.f32.partialorder %v1591_v14, %v4062_v39 }
 0x1be   :  { %1339 = vmatmul.bf16.vlgmr.msrb.gmra.mxu1 %v2241_v4  ;;  %vm1714_vm1 = vmor %vm1666_vm3, %vm1698_vm0  ;;  %vm5068_vm3 = vnez %v4658_v9  ;;  %v1380_v9 = vpop.permute.xlu1 %1379 }
 0x1bf   :  { %vm2190_vm9 = vmpackc.low %vm1714_vm1, %vm1713_vm7  ;;  %vm1448_vm7 = vcmp.gt.f32.partialorder %v1390_v26, %v4069_v57  ;;  %vm1663_vm1 = vcmp.gt.f32.partialorder %v1601_v50, %v4062_v39 }
 0x1c0   :  { %2191 = vmatpush.bf16.msk.msrb.mxu3 %vm2190_vm9, %v2240_v11  ;;  %vm1495_vm14 = vmor %vm1447_vm11, %vm5063_vm12  ;;  %vm1464_vm9 = vcmp.eq.f32.partialorder %v1390_v26, %v4069_v57  ;;  %vm1460_vm11 = vcmp.eq.f32.partialorder %v1370_v37, %v4069_v57 }
 0x1c1   :  { %vm4475_vm13 = vmor %vm1664_vm8, %vm5064_vm6  ;;  %vm5069_vm6 = vnez %v4693_v44  ;;  %v1375_v48 = vpop.permute.xlu0 %1374 }
 0x1c2   :  { %vm1695_vm15 = vmand %vm1679_vm5, %vm5067_vm4 }
 0x1c3   :  { %vm1480_vm0 = vmand %vm1464_vm9, %vm5068_vm3  ;;  %vm5075_vm9 = vnez %v4691_v5  ;;  %vm1445_vm3 = vcmp.gt.f32.partialorder %v1375_v48, %v4069_v57 }
 0x1c4   :  { %vm1496_vm2 = vmor %vm1448_vm7, %vm1480_vm0  ;;  %vm5072_vm7 = vnez %v4623_v32  ;;  %vm1461_vm0 = vcmp.eq.f32.partialorder %v1375_v48, %v4069_v57 }
 0x1c5   :  { %vm2144_vm8 = vmpackc.low %vm1496_vm2, %vm1495_vm14 }
 0x1c6   :  { %2145 = vmatpush.bf16.msk.msrb.mxu2 %vm2144_vm8, %v2240_v11  ;;  %vm1711_vm12 = vmor %vm1663_vm1, %vm1695_vm15  ;;  %vm1462_vm15 = vcmp.eq.f32.partialorder %v1380_v9, %v4069_v57  ;;  %vm1661_vm8 = vcmp.gt.f32.partialorder %v1591_v14, %v4062_v39  ;;  %v1365_v60 = vpop.permute.xlu1 %1364 }
 0x1c7   :  { %vm2192_vm5 = vmpackc.low %vm4475_vm13, %vm1711_vm12  ;;  %vm1446_vm13 = vcmp.gt.f32.partialorder %v1380_v9, %v4069_v57  ;;  %vm1444_vm12 = vcmp.gt.f32.partialorder %v1370_v37, %v4069_v57 }
 0x1c8   :  { %vm4493_vm4 = vmand %vm1677_vm10, %vm5069_vm6  ;;  %2193 = vmatpush.bf16.msk.msrb.mxu3 %vm2192_vm5, %v2240_v11 }
 0x1c9   :  { %vm4500_vm14 = vmand %vm1460_vm11, %vm5072_vm7  ;;  %v1596_v44 = vpop.permute.xlu0 %1595 }
 0x1ca   :  { %vm1478_vm1 = vmand %vm1462_vm15, %vm5075_vm9  ;;  %vm1443_vm9 = vcmp.gt.f32.partialorder %v1365_v60, %v4069_v57 }
 0x1cb   :  { %vm1477_vm2 = vmand %vm1461_vm0, %vm5069_vm6  ;;  %vm1459_vm6 = vcmp.eq.f32.partialorder %v1365_v60, %v4069_v57  ;;  %vm1662_vm0 = vcmp.gt.f32.partialorder %v1596_v44, %v4062_v39 }
 0x1cc   :  { %vm1493_vm10 = vmor %vm1445_vm3, %vm1477_vm2  ;;  %vm5076_vm3 = vnez %v4645_v53  ;;  %vm5077_vm2 = vnez %v4691_v5 }
 0x1cd   :  { %vm1494_vm11 = vmor %vm1446_vm13, %vm1478_vm1  ;;  %vm1678_vm1 = vcmp.eq.f32.partialorder %v1596_v44, %v4062_v39 }
 0x1ce   :  { %vm2146_vm5 = vmpackc.low %vm1494_vm11, %vm1493_vm10  ;;  %v1586_v57 = vpop.permute.xlu1 %1585 }
 0x1cf   :  { %2147 = vmatpush.bf16.msk.msrb.mxu2 %vm2146_vm5, %v2240_v11  ;;  %vm1709_vm15 = vmor %vm1661_vm8, %vm4493_vm4  ;;  %vm1676_vm5 = vcmp.eq.f32.partialorder %v1586_v57, %v4062_v39 }
 0x1d0   :  { %vm1492_vm7 = vmor %vm1444_vm12, %vm4500_vm14  ;;  %vm1660_vm12 = vcmp.gt.f32.partialorder %v1586_v57, %v4062_v39 }
 0x1d1   :  { %vm1475_vm13 = vmand %vm1459_vm6, %vm5076_vm3  ;;  %v1581_v23 = vpop.permute.xlu0 %1580  ;;  %vm5078_vm6 = vnez %v4623_v32 }
 0x1d2   :  { %vm1694_vm10 = vmand %vm1678_vm1, %vm5077_vm2 }
 0x1d3   :  { %vm1491_vm11 = vmor %vm1443_vm9, %vm1475_vm13  ;;  %vm1659_vm9 = vcmp.gt.f32.partialorder %v1581_v23, %v4062_v39 }
 0x1d4   :  { %vm2148_vm4 = vmpackc.low %vm1492_vm7, %vm1491_vm11  ;;  %vm1675_vm7 = vcmp.eq.f32.partialorder %v1581_v23, %v4062_v39  ;;  %vm1801_vm11 = vcmask 1042432  }
 0x1d5   :  { %2149 = vmatpush.bf16.msk.msrb.mxu2 %vm2148_vm4, %v2240_v11  ;;  %vm1710_vm14 = vmor %vm1662_vm0, %vm1694_vm10  ;;  %vm1799_vm10 = vcmask 1041408   ;;  %vm1803_vm4 = vcmask 1043456  }
 0x1d6   :  { %vm2194_vm8 = vmpackc.low %vm1710_vm14, %vm1709_vm15  ;;  %vm5079_vm15 = vnez %v4645_v53  ;;  %vm1805_vm14 = vcmask 1044480  }
 0x1d7   :  { %2195 = vmatpush.bf16.msk.msrb.mxu3 %vm2194_vm8, %v2240_v11  ;;  %vm1692_vm3 = vmand %vm1676_vm5, %vm5078_vm6  ;;  %vm1807_vm8 = vcmask 1045504  }
 0x1d8   :  { %1555 = vmatmul.bf16.vlgmr.msrb.gmra.mxu2 %v2241_v4  ;;  %vm1708_vm13 = vmor %vm1660_vm12, %vm1692_vm3  ;;  %vm1797_vm3 = vcmask 1040384   ;;  %vm1809_vm12 = vcmask 1046528  }
 0x1d9   :  { %vm1691_vm1 = vmand %vm1675_vm7, %vm5079_vm15 }
 0x1da   :  { %vm1707_vm0 = vmor %vm1659_vm9, %vm1691_vm1 }
 0x1db   :  { %vm2196_vm2 = vmpackc.low %vm1708_vm13, %vm1707_vm0 }
 0x1dc   :  { %2197 = vmatpush.bf16.msk.msrb.mxu3 %vm2196_vm2, %v2240_v11 }
 0x1df   :  { %1771 = vmatmul.bf16.vlgmr.msrb.gmra.mxu3 %v2241_v4 }
 0x203   :  { %v260_v5 = vpop.f32.mrf.mxu0  ;;  %v476_v41 = vpop.f32.mrf.mxu1 }
 0x204   :  { %v1777_v53 = vrot.slane %v476_v41, 7 }
 0x206   :  { %v1798_v56 = vsel %vm1797_vm3, %v260_v5, %v1777_v53 }
 0x20a   :  { %v692_v59 = vpop.f32.mrf.mxu2  ;;  %v908_v51 = vpop.f32.mrf.mxu3 }
 0x20b   :  { %v262_v32 = vpop.f32.mrf.mxu0  ;;  %v478_v27 = vpop.f32.mrf.mxu1  ;;  %v1780_v17 = vrot.slane %v692_v59, 6  ;;  %v1783_v11 = vrot.slane %v908_v51, 5 }
 0x20d   :  { %v1800_v2 = vsel %vm1799_vm10, %v1798_v56, %v1780_v17 }
 0x20e   :  { %v1802_v47 = vsel %vm1801_vm11, %v1800_v2, %v1783_v11 }
 0x212   :  { %v694_v12 = vpop.f32.mrf.mxu2  ;;  %v910_v18 = vpop.f32.mrf.mxu3 }
 0x213   :  { %v1124_v20 = vpop.f32.mrf.mxu0 }
 0x214   :  { %v1786_v52 = vrot.slane %v1124_v20, 4 }
 0x216   :  { %v1804_v49 = vsel %vm1803_vm4, %v1802_v47, %v1786_v52 }
 0x21b   :  { %v1126_v39 = vpop.f32.mrf.mxu0 }
 0x23b   :  { %v1340_v13 = vpop.f32.mrf.mxu1 }
 0x23c   :  { %v1789_v54 = vrot.slane %v1340_v13, 3 }
 0x23e   :  { %v1806_v10 = vsel %vm1805_vm14, %v1804_v49, %v1789_v54 }
 0x243   :  { %v1342_v1 = vpop.f32.mrf.mxu1 }
 0x25b   :  { %v1556_v8 = vpop.f32.mrf.mxu2 }
 0x25c   :  { %v1792_v33 = vrot.slane %v1556_v8, 2 }
 0x25e   :  { %v1808_v35 = vsel %vm1807_vm8, %v1806_v10, %v1792_v33 }
 0x262   :  { %v1772_v63 = vpop.f32.mrf.mxu3 }
 0x263   :  { %v1558_v29 = vpop.f32.mrf.mxu2  ;;  %v1795_v16 = vrot.slane %v1772_v63, 1 }
 0x265   :  { %v1810_v45 = vsel %vm1809_vm12, %v1808_v35, %v1795_v16 }
 0x266   :  { %vm1811_vm5 = vcmp.lt.f32.partialorder %v1810_v45, 25.0 }
 0x267   :  { %v1812_v36 = vsel %vm1811_vm5, %v13_v25, 0.0 }
 0x268   :  { %1813 = vst [vmem:[#allocation2] sm:$0xff] %v1812_v36 }
 0x269   :  { %1824 = dma.vmem_to_hbm [thread:$0]  %s1820_s29, 128, %s1822_s4, [#allocation3]  }
 0x26a   :  { %v1774_v62 = vpop.f32.mrf.mxu3 }
 0x26b   :  { %2237 = dma.done.wait [#allocation3], 128  }
 0x26c   :  { %2238 = vsyncadd [#allocation3], 4294967168 }
 0x26d   :  { %1829 = vsyncpa [#allocation3], 1 }

</bundles_post_ra>
